<compile_context>
chip_gen: v7x
topology: tpu7x:2x2x1
jax: 0.10.0
libtpu: 0.0.40
codegen_flags: <defaults>
</compile_context>

<pallas_src>
import functools
from typing import NamedTuple

import jax
import jax.numpy as jnp
from jax import lax
from jax.experimental import pallas as pl
from jax.experimental.pallas import tpu as pltpu


class ModelConfig(NamedTuple):
    vocab_size: int = 64
    d_model: int = 32
    n_layers: int = 2
    d_state: int = 16
    d_conv: int = 4
    expand: int = 2


_CHUNK = 8                      # scan timesteps statically unrolled per chunk
_SEQ_TILE_MAX = 128             # max seq timesteps resident in VMEM per scan grid step
_VMEM_LIMIT = 64 * 1024 * 1024  # explicit scoped-VMEM cap (safe for v5e/v6e/v7x)


def _round_up(x, m):
    return (x + m - 1) // m * m


def _row_grid(m, tm_max=1024):
    # Row tiling for the projection kernels: one full block if it fits, else 1024-row tiles.
    if m <= tm_max:
        return m, 1
    return tm_max, pl.cdiv(m, tm_max)


# ----------------------------- Pallas kernels -----------------------------

def _rmsnorm_in_proj_kernel(x_ref, nw_ref, w_ref, xc_ref, z_ref, *, eps, d_inner):
    # RMSNorm (f32 stats, rsqrt on the EUP) fused with the bf16 in_proj matmul; the
    # x-half and z-half are written as separate outputs (no extra XLA slice pass).
    x = x_ref[...]
    inv = lax.rsqrt(jnp.mean(x * x, axis=-1, keepdims=True) + eps)
    xn = (x * inv * nw_ref[...]).astype(jnp.bfloat16)
    xz = jnp.dot(xn, w_ref[...], preferred_element_type=jnp.float32)
    xc_ref[...] = xz[:, :d_inner]
    z_ref[...] = xz[:, d_inner:]


def _rmsnorm_matmul_kernel(x_ref, nw_ref, w_ref, o_ref, *, eps):
    # Fused norm_f + lm_head.
    x = x_ref[...]
    inv = lax.rsqrt(jnp.mean(x * x, axis=-1, keepdims=True) + eps)
    xn = (x * inv * nw_ref[...]).astype(jnp.bfloat16)
    o_ref[...] = jnp.dot(xn, w_ref[...], preferred_element_type=jnp.float32)


def _gated_residual_kernel(y_ref, z_ref, x_ref, w_ref, o_ref):
    # out = x + (y * silu(z)) @ W_out   (Dropout(0.1) is identity at inference.)
    z = z_ref[...]
    g = (y_ref[...] * z * jax.nn.sigmoid(z)).astype(jnp.bfloat16)
    o_ref[...] = x_ref[...] + jnp.dot(g, w_ref[...], preferred_element_type=jnp.float32)


def _conv_scan_kernel(xc_ref, conv_w_ref, conv_b_ref, bcdt_w_ref, dt_b_ref,
                      a_ref, d_ref, y_ref,
                      u_scr, dt_scr, b_scr, c_scr, state_ref, carry_ref,
                      *, d_conv, d_state, n_chunks, seq_tile):
    # Per grid cell (batch b, seq tile s):
    #   xc_ref / y_ref : (1, T, C)   C = d_inner on lanes
    #   conv_w_ref     : (K, C)      depthwise taps   conv_b_ref / dt_b_ref / d_ref : (1, C)
    #   bcdt_w_ref     : (C, 2N+C)   fused [x_proj | dt_proj] (bf16)
    #   a_ref          : (N, C)      (-exp(A_log)).T
    #   state_ref (N,C), carry_ref (K-1,C) persist across seq tiles (grid iterations).
    T, K, N = seq_tile, d_conv, d_state
    C = u_scr.shape[1]

    @pl.when(pl.program_id(1) == 0)
    def _():
        state_ref[...] = jnp.zeros_like(state_ref)
        carry_ref[...] = jnp.zeros_like(carry_ref)

    # ---- causal depthwise conv1d + SiLU (d_conv-1 halo carried across seq tiles) ----
    x_t = xc_ref[0]                                              # (T, C)
    full = jnp.concatenate([carry_ref[...], x_t], axis=0)        # (T+K-1, C)
    conv = jnp.broadcast_to(conv_b_ref[...], (T, C))
    for k in range(K):                                           # tiny static unroll
        conv = conv + full[k:k + T, :] * conv_w_ref[k:k + 1, :]
    u = conv * jax.nn.sigmoid(conv)                              # SiLU -> scan input u
    carry_ref[...] = x_t[T - (K - 1):, :]                        # halo for the next tile

    # ---- fused x_proj | dt_proj: one MXU matmul per tile, softplus on the dt columns ----
    bcdt = jnp.dot(u.astype(jnp.bfloat16), bcdt_w_ref[...],
                   preferred_element_type=jnp.float32)           # (T, 2N + C)
    u_scr[...] = u
    b_scr[...] = bcdt[:, :N]
    c_scr[...] = bcdt[:, N:2 * N]
    dt_scr[...] = jax.nn.softplus(bcdt[:, 2 * N:] + dt_b_ref[...])

    a = a_ref[...]                                               # (N, C)
    d_skip = d_ref[...]                                          # (1, C)

    def chunk_body(ci, state):
        c0 = pl.multiple_of(ci * _CHUNK, _CHUNK)
        u_c = u_scr[pl.ds(c0, _CHUNK), :]                        # (CH, C)
        dt_c = dt_scr[pl.ds(c0, _CHUNK), :]                      # (CH, C)
        du_c = dt_c * u_c                                        # dt*u, off the serial chain
        b_tr = b_scr[pl.ds(c0, _CHUNK), :].T                     # (N, CH) one transpose/chunk
        c_tr = c_scr[pl.ds(c0, _CHUNK), :].T                     # (N, CH)

        ys = []
        for j in range(_CHUNK):                                  # static unroll
            # dA / dbu are independent of `state`; the EUP/VPU pipeline them ahead of the
            # serial chain, which is a single VPU fma per step (no MXU, no exp on the chain).
            dA = jnp.exp(dt_c[j:j + 1, :] * a)                   # (N, C)
            dbu = b_tr[:, j:j + 1] * du_c[j:j + 1, :]            # (N,1)*(1,C) -> (N, C)
            state = dA * state + dbu
            y_j = (jnp.sum(c_tr[:, j:j + 1] * state, axis=0, keepdims=True)
                   + d_skip * u_c[j:j + 1, :])                   # (1, C) XLU sublane reduce
            ys.append(y_j)

        # y rows assembled in registers -> aligned (8, C) chunk store
        y_ref[0, pl.ds(c0, _CHUNK), :] = jnp.concatenate(ys, axis=0)
        return state

    state_ref[...] = lax.fori_loop(0, n_chunks, chunk_body, state_ref[...])


# ----------------------------- kernel wrappers -----------------------------

def rmsnorm_in_proj(x2d, norm_w, w, d_inner, eps=1e-5):
    m, d = x2d.shape
    tm, gm = _row_grid(m)
    return pl.pallas_call(
        functools.partial(_rmsnorm_in_proj_kernel, eps=eps, d_inner=d_inner),
        out_shape=(jax.ShapeDtypeStruct((m, d_inner), jnp.float32),
                   jax.ShapeDtypeStruct((m, d_inner), jnp.float32)),
        grid_spec=pltpu.PrefetchScalarGridSpec(
            num_scalar_prefetch=0,
            grid=(gm,),
            in_specs=[
                pl.BlockSpec((tm, d), lambda i: (i, 0)),
                pl.BlockSpec((1, d), lambda i: (0, 0)),
                pl.BlockSpec((d, 2 * d_inner), lambda i: (0, 0)),
            ],
            out_specs=[pl.BlockSpec((tm, d_inner), lambda i: (i, 0)),
                       pl.BlockSpec((tm, d_inner), lambda i: (i, 0))],
        ),
        compiler_params=pltpu.CompilerParams(
            dimension_semantics=("parallel",), vmem_limit_bytes=_VMEM_LIMIT),
    )(x2d, norm_w, w)


def rmsnorm_matmul(x2d, norm_w, w, eps=1e-5):
    m, d = x2d.shape
    n = w.shape[1]
    tm, gm = _row_grid(m)
    return pl.pallas_call(
        functools.partial(_rmsnorm_matmul_kernel, eps=eps),
        out_shape=jax.ShapeDtypeStruct((m, n), jnp.float32),
        grid_spec=pltpu.PrefetchScalarGridSpec(
            num_scalar_prefetch=0,
            grid=(gm,),
            in_specs=[
                pl.BlockSpec((tm, d), lambda i: (i, 0)),
                pl.BlockSpec((1, d), lambda i: (0, 0)),
                pl.BlockSpec((d, n), lambda i: (0, 0)),
            ],
            out_specs=pl.BlockSpec((tm, n), lambda i: (i, 0)),
        ),
        compiler_params=pltpu.CompilerParams(
            dimension_semantics=("parallel",), vmem_limit_bytes=_VMEM_LIMIT),
    )(x2d, norm_w, w)


def gated_residual_out_proj(y2d, z2d, x2d, w):
    m, c = y2d.shape
    d = w.shape[1]
    tm, gm = _row_grid(m)
    return pl.pallas_call(
        _gated_residual_kernel,
        out_shape=jax.ShapeDtypeStruct((m, d), jnp.float32),
        grid_spec=pltpu.PrefetchScalarGridSpec(
            num_scalar_prefetch=0,
            grid=(gm,),
            in_specs=[
                pl.BlockSpec((tm, c), lambda i: (i, 0)),
                pl.BlockSpec((tm, c), lambda i: (i, 0)),
                pl.BlockSpec((tm, d), lambda i: (i, 0)),
                pl.BlockSpec((c, d), lambda i: (0, 0)),
            ],
            out_specs=pl.BlockSpec((tm, d), lambda i: (i, 0)),
        ),
        compiler_params=pltpu.CompilerParams(
            dimension_semantics=("parallel",), vmem_limit_bytes=_VMEM_LIMIT),
    )(y2d, z2d, x2d, w)


def fused_conv_scan(xc3, conv_w, conv_b, bcdt_w, dt_bias, a_neg_t, d_skip):
    batch, seqlen, c = xc3.shape
    k = conv_w.shape[0]
    n = a_neg_t.shape[0]
    pw = bcdt_w.shape[1]

    if seqlen <= _SEQ_TILE_MAX:
        t = _round_up(seqlen, _CHUNK)
        s_pad = t
    else:
        t = _SEQ_TILE_MAX
        s_pad = _round_up(seqlen, t)
    if s_pad != seqlen:
        xc3 = jnp.pad(xc3, ((0, 0), (0, s_pad - seqlen), (0, 0)))

    y = pl.pallas_call(
        functools.partial(_conv_scan_kernel, d_conv=k, d_state=n,
                          n_chunks=t // _CHUNK, seq_tile=t),
        out_shape=jax.ShapeDtypeStruct((batch, s_pad, c), jnp.float32),
        grid_spec=pltpu.PrefetchScalarGridSpec(
            num_scalar_prefetch=0,
            grid=(batch, s_pad // t),
            in_specs=[
                pl.BlockSpec((1, t, c), lambda b, s: (b, s, 0)),   # xc (seq-tiled)
                pl.BlockSpec((k, c), lambda b, s: (0, 0)),         # conv taps
                pl.BlockSpec((1, c), lambda b, s: (0, 0)),         # conv bias
                pl.BlockSpec((c, pw), lambda b, s: (0, 0)),        # [x_proj | dt_proj] (bf16)
                pl.BlockSpec((1, c), lambda b, s: (0, 0)),         # dt_proj bias
                pl.BlockSpec((n, c), lambda b, s: (0, 0)),         # (-exp(A_log)).T
                pl.BlockSpec((1, c), lambda b, s: (0, 0)),         # D
            ],
            out_specs=pl.BlockSpec((1, t, c), lambda b, s: (b, s, 0)),
            scratch_shapes=[
                pltpu.VMEM((t, c), jnp.float32),        # u   (conv+SiLU output)
                pltpu.VMEM((t, c), jnp.float32),        # dt  (post-softplus)
                pltpu.VMEM((t, n), jnp.float32),        # B
                pltpu.VMEM((t, n), jnp.float32),        # C
                pltpu.VMEM((n, c), jnp.float32),        # SSM state carried across seq tiles
                pltpu.VMEM((k - 1, c), jnp.float32),    # conv halo carried across seq tiles
            ],
        ),
        compiler_params=pltpu.CompilerParams(
            dimension_semantics=("parallel", "arbitrary"),
            vmem_limit_bytes=_VMEM_LIMIT),
    )(xc3, conv_w, conv_b, bcdt_w, dt_bias, a_neg_t, d_skip)
    return y[:, :seqlen, :]


# ----------------------------- model glue -----------------------------

def init_params(key, cfg: ModelConfig):
    d_inner = int(cfg.expand * cfg.d_model)
    keys = iter(jax.random.split(key, 4 + 8 * cfg.n_layers))

    def nrm(shape):
        return 0.02 * jax.random.normal(next(keys), shape, jnp.float32)

    params = {
        "embedding": nrm((cfg.vocab_size, cfg.d_model)),
        "norm_f": jnp.ones((1, cfg.d_model), jnp.float32),
        "lm_head": nrm((cfg.d_model, cfg.vocab_size)).astype(jnp.bfloat16),
        "layers": [],
    }
    a_log = jnp.log(jnp.tile(jnp.arange(1, cfg.d_state + 1, dtype=jnp.float32),
                             (d_inner, 1)))                        # (d_inner, d_state)
    for _ in range(cfg.n_layers):
        x_proj_w = nrm((d_inner, 2 * cfg.d_state))
        dt_proj_w = nrm((d_inner, d_inner))
        layer = {
            "norm_w": jnp.ones((1, cfg.d_model), jnp.float32),
            # TODO(synk): PyTorch checkpoints store Linear weights as (out,in) and Conv1d
            # taps as weight[c, 0, k]; transpose/remap accordingly when loading real weights.
            "in_proj": nrm((cfg.d_model, 2 * d_inner)).astype(jnp.bfloat16),
            "conv_w": nrm((cfg.d_conv, d_inner)),
            "conv_b": jnp.zeros((1, d_inner), jnp.float32),
            # fused [x_proj | dt_proj] weight; x_proj has no bias, dt_proj bias kept separate
            "bcdt_w": jnp.concatenate([x_proj_w, dt_proj_w], axis=1).astype(jnp.bfloat16),
            "dt_bias": jnp.zeros((1, d_inner), jnp.float32),
            "a_neg_t": (-jnp.exp(a_log)).T,                        # precomputed (d_state, d_inner)
            "D": jnp.ones((1, d_inner), jnp.float32),
            "out_proj": nrm((d_inner, cfg.d_model)).astype(jnp.bfloat16),
        }
        params["layers"].append(layer)
    return params


def mamba_block(x, p, cfg: ModelConfig):
    batch, seqlen, d_model = x.shape
    d_inner = int(cfg.expand * cfg.d_model)

    x2d = x.reshape(batch * seqlen, d_model)
    xc2d, z2d = rmsnorm_in_proj(x2d, p["norm_w"], p["in_proj"], d_inner)

    # conv1d + SiLU + x_proj/dt_proj(+softplus) + selective scan, all fused in one kernel
    y3 = fused_conv_scan(xc2d.reshape(batch, seqlen, d_inner),
                         p["conv_w"], p["conv_b"], p["bcdt_w"], p["dt_bias"],
                         p["a_neg_t"], p["D"])

    # y * silu(z) -> out_proj -> + residual (Dropout is identity in eval)
    out = gated_residual_out_proj(y3.reshape(batch * seqlen, d_inner), z2d, x2d,
                                  p["out_proj"])
    return out.reshape(batch, seqlen, d_model)


@functools.partial(jax.jit, static_argnums=(2,))
def mamba_forward(params, input_ids, cfg: ModelConfig):
    batch, seqlen = input_ids.shape
    # embedding lookup (gather) kept in plain JAX glue
    x = jnp.take(params["embedding"], input_ids, axis=0)
    for p in params["layers"]:
        x = mamba_block(x, p, cfg)
    logits = rmsnorm_matmul(x.reshape(batch * seqlen, cfg.d_model),
                            params["norm_f"], params["lm_head"])   # fused norm_f + lm_head
    # TODO(synk): optional cross-entropy loss path (labels) not implemented; logits only.
    return logits.reshape(batch, seqlen, cfg.vocab_size)


if __name__ == "__main__":
    cfg = ModelConfig(vocab_size=64, d_model=32, n_layers=2, d_state=16, d_conv=4, expand=2)
    key = jax.random.PRNGKey(0)
    k_params, k_ids = jax.random.split(key)
    params = init_params(k_params, cfg)
    input_ids = jax.random.randint(k_ids, (2, 8), 0, cfg.vocab_size)

    logits = mamba_forward(params, input_ids, cfg)
    jax.block_until_ready(logits)
    assert logits.shape == (2, 8, cfg.vocab_size)
    assert bool(jnp.all(jnp.isfinite(logits)))
    print("KERNEL_OK")
</pallas_src>

<mosaic_0001>
module attributes {stable_mosaic.version = 11 : i64} {
  func.func @_rmsnorm_in_proj_kernel(%arg0: i32, %arg1: memref<16x32xf32, #tpu.memory_space<vmem>>, %arg2: memref<1x32xf32, #tpu.memory_space<vmem>>, %arg3: memref<32x128xbf16, #tpu.memory_space<vmem>>, %arg4: memref<16x64xf32, #tpu.memory_space<vmem>>, %arg5: memref<16x64xf32, #tpu.memory_space<vmem>>) attributes {dimension_semantics = [#tpu.dimension_semantics<parallel>], iteration_bounds = array<i64: 1>, scalar_prefetch = 0 : i64, scratch_operands = 0 : i64, tpu.core_type = #tpu.core_type<tc>, window_params = [{transform_indices = @transform_0, window_bounds = array<i64: 16, 32>}, {pipeline_mode = #tpu.pipeline_mode<synchronous>, transform_indices = @transform_1, window_bounds = array<i64: 1, 32>}, {pipeline_mode = #tpu.pipeline_mode<synchronous>, transform_indices = @transform_2, window_bounds = array<i64: 32, 128>}, {transform_indices = @transform_3, window_bounds = array<i64: 16, 64>}, {transform_indices = @transform_4, window_bounds = array<i64: 16, 64>}]} {
    %c0 = arith.constant 0 : index
    %c0_0 = arith.constant 0 : index
    %0 = vector.load %arg1[%c0, %c0_0] : memref<16x32xf32, #tpu.memory_space<vmem>>, vector<16x32xf32>
    %1 = arith.mulf %0, %0 : vector<16x32xf32>
    %cst = arith.constant dense<0.000000e+00> : vector<16xf32>
    %2 = vector.multi_reduction <add>, %1, %cst [1] : vector<16x32xf32> to vector<16xf32>
    %3 = vector.shape_cast %2 : vector<16xf32> to vector<16x1xf32>
    %cst_1 = arith.constant 3.200000e+01 : f32
    %4 = vector.broadcast %cst_1 : f32 to vector<16x1xf32>
    %5 = arith.divf %3, %4 : vector<16x1xf32>
    %cst_2 = arith.constant 9.99999974E-6 : f32
    %6 = vector.broadcast %cst_2 : f32 to vector<16x1xf32>
    %7 = arith.addf %5, %6 : vector<16x1xf32>
    %8 = math.rsqrt %7 : vector<16x1xf32>
    %9 = vector.broadcast %8 : vector<16x1xf32> to vector<16x32xf32>
    %10 = arith.mulf %0, %9 : vector<16x32xf32>
    %c0_3 = arith.constant 0 : index
    %c0_4 = arith.constant 0 : index
    %11 = vector.load %arg2[%c0_3, %c0_4] : memref<1x32xf32, #tpu.memory_space<vmem>>, vector<1x32xf32>
    %12 = vector.broadcast %11 : vector<1x32xf32> to vector<16x32xf32>
    %13 = arith.mulf %10, %12 : vector<16x32xf32>
    %14 = arith.truncf %13 : vector<16x32xf32> to vector<16x32xbf16>
    %c0_5 = arith.constant 0 : index
    %c0_6 = arith.constant 0 : index
    %15 = vector.load %arg3[%c0_5, %c0_6] : memref<32x128xbf16, #tpu.memory_space<vmem>>, vector<32x128xbf16>
    %cst_7 = arith.constant dense<0.000000e+00> : vector<16x128xf32>
    %16 = tpu.matmul %14, %15, %cst_7 {dimension_numbers = #tpu.dot_dimension_numbers<[1], [0], [0], [1], [0, 0, 1, 1], [], []>} : vector<16x32xbf16>, vector<32x128xbf16>, vector<16x128xf32> -> vector<16x128xf32>
    %17 = vector.extract_strided_slice %16 {offsets = [0, 0], sizes = [16, 64], strides = [1, 1]} : vector<16x128xf32> to vector<16x64xf32>
    %c0_8 = arith.constant 0 : index
    %c0_9 = arith.constant 0 : index
    %18 = vector.load %arg4[%c0_8, %c0_9] : memref<16x64xf32, #tpu.memory_space<vmem>>, vector<16x64xf32>
    tpu.vector_store %arg4[%c0_8, %c0_9], %17 {strides = array<i32>} : memref<16x64xf32, #tpu.memory_space<vmem>>, vector<16x64xf32>,
    %19 = vector.extract_strided_slice %16 {offsets = [0, 64], sizes = [16, 64], strides = [1, 1]} : vector<16x128xf32> to vector<16x64xf32>
    %c0_10 = arith.constant 0 : index
    %c0_11 = arith.constant 0 : index
    %20 = vector.load %arg5[%c0_10, %c0_11] : memref<16x64xf32, #tpu.memory_space<vmem>>, vector<16x64xf32>
    tpu.vector_store %arg5[%c0_10, %c0_11], %19 {strides = array<i32>} : memref<16x64xf32, #tpu.memory_space<vmem>>, vector<16x64xf32>,
    return
  }
  func.func @transform_0(%arg0: i32) -> (i32, i32) {
    %c0_i32 = arith.constant 0 : i32
    %c0_i32_0 = arith.constant 0 : i32
    return %arg0, %c0_i32 : i32, i32
  }
  func.func @transform_1(%arg0: i32) -> (i32, i32) {
    %c0_i32 = arith.constant 0 : i32
    %c0_i32_0 = arith.constant 0 : i32
    %c0_i32_1 = arith.constant 0 : i32
    return %c0_i32, %c0_i32_0 : i32, i32
  }
  func.func @transform_2(%arg0: i32) -> (i32, i32) {
    %c0_i32 = arith.constant 0 : i32
    %c0_i32_0 = arith.constant 0 : i32
    %c0_i32_1 = arith.constant 0 : i32
    return %c0_i32, %c0_i32_0 : i32, i32
  }
  func.func @transform_3(%arg0: i32) -> (i32, i32) {
    %c0_i32 = arith.constant 0 : i32
    %c0_i32_0 = arith.constant 0 : i32
    return %arg0, %c0_i32 : i32, i32
  }
  func.func @transform_4(%arg0: i32) -> (i32, i32) {
    %c0_i32 = arith.constant 0 : i32
    %c0_i32_0 = arith.constant 0 : i32
    return %arg0, %c0_i32 : i32, i32
  }
}

module attributes {stable_mosaic.version = 11 : i64} {
  func.func @_gated_residual_kernel(%arg0: i32, %arg1: memref<16x64xf32, #tpu.memory_space<vmem>>, %arg2: memref<16x64xf32, #tpu.memory_space<vmem>>, %arg3: memref<16x32xf32, #tpu.memory_space<vmem>>, %arg4: memref<64x32xbf16, #tpu.memory_space<vmem>>, %arg5: memref<16x32xf32, #tpu.memory_space<vmem>>) attributes {dimension_semantics = [#tpu.dimension_semantics<parallel>], iteration_bounds = array<i64: 1>, scalar_prefetch = 0 : i64, scratch_operands = 0 : i64, tpu.core_type = #tpu.core_type<tc>, window_params = [{transform_indices = @transform_0, window_bounds = array<i64: 16, 64>}, {transform_indices = @transform_1, window_bounds = array<i64: 16, 64>}, {transform_indices = @transform_2, window_bounds = array<i64: 16, 32>}, {pipeline_mode = #tpu.pipeline_mode<synchronous>, transform_indices = @transform_3, window_bounds = array<i64: 64, 32>}, {transform_indices = @transform_4, window_bounds = array<i64: 16, 32>}]} {
    %c0 = arith.constant 0 : index
    %c0_0 = arith.constant 0 : index
    %0 = vector.load %arg2[%c0, %c0_0] : memref<16x64xf32, #tpu.memory_space<vmem>>, vector<16x64xf32>
    %c0_1 = arith.constant 0 : index
    %c0_2 = arith.constant 0 : index
    %1 = vector.load %arg1[%c0_1, %c0_2] : memref<16x64xf32, #tpu.memory_space<vmem>>, vector<16x64xf32>
    %2 = arith.mulf %1, %0 : vector<16x64xf32>
    %3 = arith.negf %0 : vector<16x64xf32>
    %4 = math.exp %3 : vector<16x64xf32>
    %cst = arith.constant 1.000000e+00 : f32
    %5 = vector.broadcast %cst : f32 to vector<16x64xf32>
    %6 = arith.addf %5, %4 : vector<16x64xf32>
    %7 = arith.divf %5, %6 : vector<16x64xf32>
    %8 = arith.mulf %2, %7 : vector<16x64xf32>
    %9 = arith.truncf %8 : vector<16x64xf32> to vector<16x64xbf16>
    %c0_3 = arith.constant 0 : index
    %c0_4 = arith.constant 0 : index
    %10 = vector.load %arg3[%c0_3, %c0_4] : memref<16x32xf32, #tpu.memory_space<vmem>>, vector<16x32xf32>
    %c0_5 = arith.constant 0 : index
    %c0_6 = arith.constant 0 : index
    %11 = vector.load %arg4[%c0_5, %c0_6] : memref<64x32xbf16, #tpu.memory_space<vmem>>, vector<64x32xbf16>
    %cst_7 = arith.constant dense<0.000000e+00> : vector<16x32xf32>
    %12 = tpu.matmul %9, %11, %cst_7 {dimension_numbers = #tpu.dot_dimension_numbers<[1], [0], [0], [1], [0, 0, 1, 1], [], []>} : vector<16x64xbf16>, vector<64x32xbf16>, vector<16x32xf32> -> vector<16x32xf32>
    %13 = arith.addf %10, %12 : vector<16x32xf32>
    %c0_8 = arith.constant 0 : index
    %c0_9 = arith.constant 0 : index
    %14 = vector.load %arg5[%c0_8, %c0_9] : memref<16x32xf32, #tpu.memory_space<vmem>>, vector<16x32xf32>
    tpu.vector_store %arg5[%c0_8, %c0_9], %13 {strides = array<i32>} : memref<16x32xf32, #tpu.memory_space<vmem>>, vector<16x32xf32>,
    return
  }
  func.func @transform_0(%arg0: i32) -> (i32, i32) {
    %c0_i32 = arith.constant 0 : i32
    %c0_i32_0 = arith.constant 0 : i32
    return %arg0, %c0_i32 : i32, i32
  }
  func.func @transform_1(%arg0: i32) -> (i32, i32) {
    %c0_i32 = arith.constant 0 : i32
    %c0_i32_0 = arith.constant 0 : i32
    return %arg0, %c0_i32 : i32, i32
  }
  func.func @transform_2(%arg0: i32) -> (i32, i32) {
    %c0_i32 = arith.constant 0 : i32
    %c0_i32_0 = arith.constant 0 : i32
    return %arg0, %c0_i32 : i32, i32
  }
  func.func @transform_3(%arg0: i32) -> (i32, i32) {
    %c0_i32 = arith.constant 0 : i32
    %c0_i32_0 = arith.constant 0 : i32
    %c0_i32_1 = arith.constant 0 : i32
    return %c0_i32, %c0_i32_0 : i32, i32
  }
  func.func @transform_4(%arg0: i32) -> (i32, i32) {
    %c0_i32 = arith.constant 0 : i32
    %c0_i32_0 = arith.constant 0 : i32
    return %arg0, %c0_i32 : i32, i32
  }
}

module attributes {stable_mosaic.version = 11 : i64} {
  func.func @_conv_scan_kernel(%arg0: i32, %arg1: i32, %arg2: memref<1x8x64xf32, #tpu.memory_space<vmem>>, %arg3: memref<4x64xf32, #tpu.memory_space<vmem>>, %arg4: memref<1x64xf32, #tpu.memory_space<vmem>>, %arg5: memref<64x96xbf16, #tpu.memory_space<vmem>>, %arg6: memref<1x64xf32, #tpu.memory_space<vmem>>, %arg7: memref<16x64xf32, #tpu.memory_space<vmem>>, %arg8: memref<1x64xf32, #tpu.memory_space<vmem>>, %arg9: memref<1x8x64xf32, #tpu.memory_space<vmem>>, %arg10: memref<8x64xf32, #tpu.memory_space<vmem>>, %arg11: memref<8x64xf32, #tpu.memory_space<vmem>>, %arg12: memref<8x16xf32, #tpu.memory_space<vmem>>, %arg13: memref<8x16xf32, #tpu.memory_space<vmem>>, %arg14: memref<16x64xf32, #tpu.memory_space<vmem>>, %arg15: memref<3x64xf32, #tpu.memory_space<vmem>>) attributes {dimension_semantics = [#tpu.dimension_semantics<parallel>, #tpu.dimension_semantics<arbitrary>], iteration_bounds = array<i64: 2, 1>, scalar_prefetch = 0 : i64, scratch_operands = 6 : i64, tpu.core_type = #tpu.core_type<tc>, window_params = [{transform_indices = @transform_0, window_bounds = array<i64: 1, 8, 64>}, {pipeline_mode = #tpu.pipeline_mode<synchronous>, transform_indices = @transform_1, window_bounds = array<i64: 4, 64>}, {pipeline_mode = #tpu.pipeline_mode<synchronous>, transform_indices = @transform_2, window_bounds = array<i64: 1, 64>}, {pipeline_mode = #tpu.pipeline_mode<synchronous>, transform_indices = @transform_3, window_bounds = array<i64: 64, 96>}, {pipeline_mode = #tpu.pipeline_mode<synchronous>, transform_indices = @transform_4, window_bounds = array<i64: 1, 64>}, {pipeline_mode = #tpu.pipeline_mode<synchronous>, transform_indices = @transform_5, window_bounds = array<i64: 16, 64>}, {pipeline_mode = #tpu.pipeline_mode<synchronous>, transform_indices = @transform_6, window_bounds = array<i64: 1, 64>}, {transform_indices = @transform_7, window_bounds = array<i64: 1, 8, 64>}]} {
    %c0_i32 = arith.constant 0 : i32
    %0 = arith.cmpi eq, %arg1, %c0_i32 : i32
    %1 = arith.extui %0 : i1 to i32
    %c0_i32_0 = arith.constant 0 : i32
    %2 = arith.cmpi ne, %1, %c0_i32_0 : i32
    scf.if %2 {
      %cst_52 = arith.constant 0.000000e+00 : f32
      %239 = vector.broadcast %cst_52 : f32 to vector<16x64xf32>
      %c0_53 = arith.constant 0 : index
      %c0_54 = arith.constant 0 : index
      %240 = vector.load %arg14[%c0_53, %c0_54] : memref<16x64xf32, #tpu.memory_space<vmem>>, vector<16x64xf32>
      tpu.vector_store %arg14[%c0_53, %c0_54], %239 {strides = array<i32>} : memref<16x64xf32, #tpu.memory_space<vmem>>, vector<16x64xf32>,
      %cst_55 = arith.constant 0.000000e+00 : f32
      %241 = vector.broadcast %cst_55 : f32 to vector<3x64xf32>
      %c0_56 = arith.constant 0 : index
      %c0_57 = arith.constant 0 : index
      %242 = vector.load %arg15[%c0_56, %c0_57] : memref<3x64xf32, #tpu.memory_space<vmem>>, vector<3x64xf32>
      tpu.vector_store %arg15[%c0_56, %c0_57], %241 {strides = array<i32>} : memref<3x64xf32, #tpu.memory_space<vmem>>, vector<3x64xf32>,
    } else {
    }
    %c0 = arith.constant 0 : index
    %c0_1 = arith.constant 0 : index
    %c0_2 = arith.constant 0 : index
    %3 = vector.load %arg2[%c0, %c0_1, %c0_2] : memref<1x8x64xf32, #tpu.memory_space<vmem>>, vector<1x8x64xf32>
    %4 = vector.shape_cast %3 : vector<1x8x64xf32> to vector<8x64xf32>
    %c0_3 = arith.constant 0 : index
    %c0_4 = arith.constant 0 : index
    %5 = vector.load %arg15[%c0_3, %c0_4] : memref<3x64xf32, #tpu.memory_space<vmem>>, vector<3x64xf32>
    %6 = tpu.concatenate %5, %4 in 0 : vector<3x64xf32>, vector<8x64xf32> -> vector<11x64xf32>
    %c0_5 = arith.constant 0 : index
    %c0_6 = arith.constant 0 : index
    %7 = vector.load %arg4[%c0_5, %c0_6] : memref<1x64xf32, #tpu.memory_space<vmem>>, vector<1x64xf32>
    %8 = vector.shape_cast %7 : vector<1x64xf32> to vector<1x64xf32>
    %9 = vector.broadcast %8 : vector<1x64xf32> to vector<8x64xf32>
    %10 = vector.extract_strided_slice %6 {offsets = [0, 0], sizes = [8, 64], strides = [1, 1]} : vector<11x64xf32> to vector<8x64xf32>
    %c0_7 = arith.constant 0 : index
    %c0_8 = arith.constant 0 : index
    %11 = vector.load %arg3[%c0_7, %c0_8] : memref<4x64xf32, #tpu.memory_space<vmem>>, vector<1x64xf32>
    %12 = vector.broadcast %11 : vector<1x64xf32> to vector<8x64xf32>
    %13 = arith.mulf %10, %12 : vector<8x64xf32>
    %14 = arith.addf %9, %13 : vector<8x64xf32>
    %15 = vector.extract_strided_slice %6 {offsets = [1, 0], sizes = [8, 64], strides = [1, 1]} : vector<11x64xf32> to vector<8x64xf32>
    %c1 = arith.constant 1 : index
    %c0_9 = arith.constant 0 : index
    %16 = vector.load %arg3[%c1, %c0_9] : memref<4x64xf32, #tpu.memory_space<vmem>>, vector<1x64xf32>
    %17 = vector.broadcast %16 : vector<1x64xf32> to vector<8x64xf32>
    %18 = arith.mulf %15, %17 : vector<8x64xf32>
    %19 = arith.addf %14, %18 : vector<8x64xf32>
    %20 = vector.extract_strided_slice %6 {offsets = [2, 0], sizes = [8, 64], strides = [1, 1]} : vector<11x64xf32> to vector<8x64xf32>
    %c2 = arith.constant 2 : index
    %c0_10 = arith.constant 0 : index
    %21 = vector.load %arg3[%c2, %c0_10] : memref<4x64xf32, #tpu.memory_space<vmem>>, vector<1x64xf32>
    %22 = vector.broadcast %21 : vector<1x64xf32> to vector<8x64xf32>
    %23 = arith.mulf %20, %22 : vector<8x64xf32>
    %24 = arith.addf %19, %23 : vector<8x64xf32>
    %25 = vector.extract_strided_slice %6 {offsets = [3, 0], sizes = [8, 64], strides = [1, 1]} : vector<11x64xf32> to vector<8x64xf32>
    %c3 = arith.constant 3 : index
    %c0_11 = arith.constant 0 : index
    %26 = vector.load %arg3[%c3, %c0_11] : memref<4x64xf32, #tpu.memory_space<vmem>>, vector<1x64xf32>
    %27 = vector.broadcast %26 : vector<1x64xf32> to vector<8x64xf32>
    %28 = arith.mulf %25, %27 : vector<8x64xf32>
    %29 = arith.addf %24, %28 : vector<8x64xf32>
    %30 = arith.negf %29 : vector<8x64xf32>
    %31 = math.exp %30 : vector<8x64xf32>
    %cst = arith.constant 1.000000e+00 : f32
    %32 = vector.broadcast %cst : f32 to vector<8x64xf32>
    %33 = arith.addf %32, %31 : vector<8x64xf32>
    %34 = arith.divf %32, %33 : vector<8x64xf32>
    %35 = arith.mulf %29, %34 : vector<8x64xf32>
    %36 = vector.extract_strided_slice %4 {offsets = [5, 0], sizes = [3, 64], strides = [1, 1]} : vector<8x64xf32> to vector<3x64xf32>
    %c0_12 = arith.constant 0 : index
    %c0_13 = arith.constant 0 : index
    %37 = vector.load %arg15[%c0_12, %c0_13] : memref<3x64xf32, #tpu.memory_space<vmem>>, vector<3x64xf32>
    tpu.vector_store %arg15[%c0_12, %c0_13], %36 {strides = array<i32>} : memref<3x64xf32, #tpu.memory_space<vmem>>, vector<3x64xf32>,
    %38 = arith.truncf %35 : vector<8x64xf32> to vector<8x64xbf16>
    %c0_14 = arith.constant 0 : index
    %c0_15 = arith.constant 0 : index
    %39 = vector.load %arg5[%c0_14, %c0_15] : memref<64x96xbf16, #tpu.memory_space<vmem>>, vector<64x96xbf16>
    %cst_16 = arith.constant dense<0.000000e+00> : vector<8x96xf32>
    %40 = tpu.matmul %38, %39, %cst_16 {dimension_numbers = #tpu.dot_dimension_numbers<[1], [0], [0], [1], [0, 0, 1, 1], [], []>} : vector<8x64xbf16>, vector<64x96xbf16>, vector<8x96xf32> -> vector<8x96xf32>
    %c0_17 = arith.constant 0 : index
    %c0_18 = arith.constant 0 : index
    %41 = vector.load %arg10[%c0_17, %c0_18] : memref<8x64xf32, #tpu.memory_space<vmem>>, vector<8x64xf32>
    tpu.vector_store %arg10[%c0_17, %c0_18], %35 {strides = array<i32>} : memref<8x64xf32, #tpu.memory_space<vmem>>, vector<8x64xf32>,
    %42 = vector.extract_strided_slice %40 {offsets = [0, 0], sizes = [8, 16], strides = [1, 1]} : vector<8x96xf32> to vector<8x16xf32>
    %c0_19 = arith.constant 0 : index
    %c0_20 = arith.constant 0 : index
    %43 = vector.load %arg12[%c0_19, %c0_20] : memref<8x16xf32, #tpu.memory_space<vmem>>, vector<8x16xf32>
    tpu.vector_store %arg12[%c0_19, %c0_20], %42 {strides = array<i32>} : memref<8x16xf32, #tpu.memory_space<vmem>>, vector<8x16xf32>,
    %44 = vector.extract_strided_slice %40 {offsets = [0, 16], sizes = [8, 16], strides = [1, 1]} : vector<8x96xf32> to vector<8x16xf32>
    %c0_21 = arith.constant 0 : index
    %c0_22 = arith.constant 0 : index
    %45 = vector.load %arg13[%c0_21, %c0_22] : memref<8x16xf32, #tpu.memory_space<vmem>>, vector<8x16xf32>
    tpu.vector_store %arg13[%c0_21, %c0_22], %44 {strides = array<i32>} : memref<8x16xf32, #tpu.memory_space<vmem>>, vector<8x16xf32>,
    %46 = vector.extract_strided_slice %40 {offsets = [0, 32], sizes = [8, 64], strides = [1, 1]} : vector<8x96xf32> to vector<8x64xf32>
    %c0_23 = arith.constant 0 : index
    %c0_24 = arith.constant 0 : index
    %47 = vector.load %arg6[%c0_23, %c0_24] : memref<1x64xf32, #tpu.memory_space<vmem>>, vector<1x64xf32>
    %48 = vector.broadcast %47 : vector<1x64xf32> to vector<8x64xf32>
    %49 = arith.addf %46, %48 : vector<8x64xf32>
    %cst_25 = arith.constant 0.000000e+00 : f32
    %50 = vector.broadcast %cst_25 : f32 to vector<8x64xf32>
    %51 = arith.maximumf %49, %50 : vector<8x64xf32>
    %52 = vector.broadcast %cst_25 : f32 to vector<8x64xf32>
    %53 = arith.subf %49, %52 : vector<8x64xf32>
    %54 = arith.cmpf one, %53, %53 : vector<8x64xf32>
    %55 = vector.broadcast %cst_25 : f32 to vector<8x64xf32>
    %56 = arith.addf %49, %55 : vector<8x64xf32>
    %57 = math.absf %53 : vector<8x64xf32>
    %cst_26 = arith.constant 0.000000e+00 : f32
    %58 = vector.broadcast %cst_26 : f32 to vector<8x64xf32>
    %59 = arith.subf %58, %57 : vector<8x64xf32>
    %60 = math.exp %59 : vector<8x64xf32>
    %61 = math.log1p %60 : vector<8x64xf32>
    %62 = arith.addf %51, %61 : vector<8x64xf32>
    %63 = arith.select %54, %56, %62 : vector<8x64xi1>, vector<8x64xf32>
    %c0_27 = arith.constant 0 : index
    %c0_28 = arith.constant 0 : index
    %64 = vector.load %arg11[%c0_27, %c0_28] : memref<8x64xf32, #tpu.memory_space<vmem>>, vector<8x64xf32>
    tpu.vector_store %arg11[%c0_27, %c0_28], %63 {strides = array<i32>} : memref<8x64xf32, #tpu.memory_space<vmem>>, vector<8x64xf32>,
    %c0_29 = arith.constant 0 : index
    %c0_30 = arith.constant 0 : index
    %65 = vector.load %arg7[%c0_29, %c0_30] : memref<16x64xf32, #tpu.memory_space<vmem>>, vector<16x64xf32>
    %c0_31 = arith.constant 0 : index
    %c0_32 = arith.constant 0 : index
    %66 = vector.load %arg8[%c0_31, %c0_32] : memref<1x64xf32, #tpu.memory_space<vmem>>, vector<1x64xf32>
    %c0_33 = arith.constant 0 : index
    %c0_34 = arith.constant 0 : index
    %67 = vector.load %arg14[%c0_33, %c0_34] : memref<16x64xf32, #tpu.memory_space<vmem>>, vector<16x64xf32>
    %c0_i32_35 = arith.constant 0 : i32
    %c8_i32 = arith.constant 8 : i32
    %68 = arith.muli %c0_i32_35, %c8_i32 : i32
    %69 = tpu.assume_multiple %68, 8 : i32
    %70 = arith.index_cast %69 : i32 to index
    %c0_36 = arith.constant 0 : index
    %71 = vector.load %arg10[%70, %c0_36] : memref<8x64xf32, #tpu.memory_space<vmem>>, vector<8x64xf32>
    %72 = arith.index_cast %69 : i32 to index
    %c0_37 = arith.constant 0 : index
    %73 = vector.load %arg11[%72, %c0_37] : memref<8x64xf32, #tpu.memory_space<vmem>>, vector<8x64xf32>
    %74 = arith.mulf %73, %71 : vector<8x64xf32>
    %75 = arith.index_cast %69 : i32 to index
    %c0_38 = arith.constant 0 : index
    %76 = vector.load %arg12[%75, %c0_38] : memref<8x16xf32, #tpu.memory_space<vmem>>, vector<8x16xf32>
    %77 = tpu.transpose %76, [1, 0] : vector<8x16xf32> -> vector<16x8xf32>
    %78 = arith.index_cast %69 : i32 to index
    %c0_39 = arith.constant 0 : index
    %79 = vector.load %arg13[%78, %c0_39] : memref<8x16xf32, #tpu.memory_space<vmem>>, vector<8x16xf32>
    %80 = tpu.transpose %79, [1, 0] : vector<8x16xf32> -> vector<16x8xf32>
    %81 = vector.extract_strided_slice %73 {offsets = [0, 0], sizes = [1, 64], strides = [1, 1]} : vector<8x64xf32> to vector<1x64xf32>
    %82 = vector.broadcast %81 : vector<1x64xf32> to vector<16x64xf32>
    %83 = arith.mulf %82, %65 : vector<16x64xf32>
    %84 = math.exp %83 : vector<16x64xf32>
    %85 = vector.extract_strided_slice %77 {offsets = [0, 0], sizes = [16, 1], strides = [1, 1]} : vector<16x8xf32> to vector<16x1xf32>
    %86 = vector.extract_strided_slice %74 {offsets = [0, 0], sizes = [1, 64], strides = [1, 1]} : vector<8x64xf32> to vector<1x64xf32>
    %87 = vector.broadcast %85 : vector<16x1xf32> to vector<16x64xf32>
    %88 = vector.broadcast %86 : vector<1x64xf32> to vector<16x64xf32>
    %89 = arith.mulf %87, %88 : vector<16x64xf32>
    %90 = arith.mulf %84, %67 : vector<16x64xf32>
    %91 = arith.addf %90, %89 : vector<16x64xf32>
    %92 = vector.extract_strided_slice %80 {offsets = [0, 0], sizes = [16, 1], strides = [1, 1]} : vector<16x8xf32> to vector<16x1xf32>
    %93 = vector.broadcast %92 : vector<16x1xf32> to vector<16x64xf32>
    %94 = arith.mulf %93, %91 : vector<16x64xf32>
    %cst_40 = arith.constant dense<0.000000e+00> : vector<64xf32>
    %95 = vector.multi_reduction <add>, %94, %cst_40 [0] : vector<16x64xf32> to vector<64xf32>
    %96 = vector.shape_cast %95 : vector<64xf32> to vector<1x64xf32>
    %97 = vector.extract_strided_slice %71 {offsets = [0, 0], sizes = [1, 64], strides = [1, 1]} : vector<8x64xf32> to vector<1x64xf32>
    %98 = arith.mulf %66, %97 : vector<1x64xf32>
    %99 = arith.addf %96, %98 : vector<1x64xf32>
    %100 = vector.extract_strided_slice %73 {offsets = [1, 0], sizes = [1, 64], strides = [1, 1]} : vector<8x64xf32> to vector<1x64xf32>
    %101 = vector.broadcast %100 : vector<1x64xf32> to vector<16x64xf32>
    %102 = arith.mulf %101, %65 : vector<16x64xf32>
    %103 = math.exp %102 : vector<16x64xf32>
    %104 = vector.extract_strided_slice %77 {offsets = [0, 1], sizes = [16, 1], strides = [1, 1]} : vector<16x8xf32> to vector<16x1xf32>
    %105 = vector.extract_strided_slice %74 {offsets = [1, 0], sizes = [1, 64], strides = [1, 1]} : vector<8x64xf32> to vector<1x64xf32>
    %106 = vector.broadcast %104 : vector<16x1xf32> to vector<16x64xf32>
    %107 = vector.broadcast %105 : vector<1x64xf32> to vector<16x64xf32>
    %108 = arith.mulf %106, %107 : vector<16x64xf32>
    %109 = arith.mulf %103, %91 : vector<16x64xf32>
    %110 = arith.addf %109, %108 : vector<16x64xf32>
    %111 = vector.extract_strided_slice %80 {offsets = [0, 1], sizes = [16, 1], strides = [1, 1]} : vector<16x8xf32> to vector<16x1xf32>
    %112 = vector.broadcast %111 : vector<16x1xf32> to vector<16x64xf32>
    %113 = arith.mulf %112, %110 : vector<16x64xf32>
    %cst_41 = arith.constant dense<0.000000e+00> : vector<64xf32>
    %114 = vector.multi_reduction <add>, %113, %cst_41 [0] : vector<16x64xf32> to vector<64xf32>
    %115 = vector.shape_cast %114 : vector<64xf32> to vector<1x64xf32>
    %116 = vector.extract_strided_slice %71 {offsets = [1, 0], sizes = [1, 64], strides = [1, 1]} : vector<8x64xf32> to vector<1x64xf32>
    %117 = arith.mulf %66, %116 : vector<1x64xf32>
    %118 = arith.addf %115, %117 : vector<1x64xf32>
    %119 = vector.extract_strided_slice %73 {offsets = [2, 0], sizes = [1, 64], strides = [1, 1]} : vector<8x64xf32> to vector<1x64xf32>
    %120 = vector.broadcast %119 : vector<1x64xf32> to vector<16x64xf32>
    %121 = arith.mulf %120, %65 : vector<16x64xf32>
    %122 = math.exp %121 : vector<16x64xf32>
    %123 = vector.extract_strided_slice %77 {offsets = [0, 2], sizes = [16, 1], strides = [1, 1]} : vector<16x8xf32> to vector<16x1xf32>
    %124 = vector.extract_strided_slice %74 {offsets = [2, 0], sizes = [1, 64], strides = [1, 1]} : vector<8x64xf32> to vector<1x64xf32>
    %125 = vector.broadcast %123 : vector<16x1xf32> to vector<16x64xf32>
    %126 = vector.broadcast %124 : vector<1x64xf32> to vector<16x64xf32>
    %127 = arith.mulf %125, %126 : vector<16x64xf32>
    %128 = arith.mulf %122, %110 : vector<16x64xf32>
    %129 = arith.addf %128, %127 : vector<16x64xf32>
    %130 = vector.extract_strided_slice %80 {offsets = [0, 2], sizes = [16, 1], strides = [1, 1]} : vector<16x8xf32> to vector<16x1xf32>
    %131 = vector.broadcast %130 : vector<16x1xf32> to vector<16x64xf32>
    %132 = arith.mulf %131, %129 : vector<16x64xf32>
    %cst_42 = arith.constant dense<0.000000e+00> : vector<64xf32>
    %133 = vector.multi_reduction <add>, %132, %cst_42 [0] : vector<16x64xf32> to vector<64xf32>
    %134 = vector.shape_cast %133 : vector<64xf32> to vector<1x64xf32>
    %135 = vector.extract_strided_slice %71 {offsets = [2, 0], sizes = [1, 64], strides = [1, 1]} : vector<8x64xf32> to vector<1x64xf32>
    %136 = arith.mulf %66, %135 : vector<1x64xf32>
    %137 = arith.addf %134, %136 : vector<1x64xf32>
    %138 = vector.extract_strided_slice %73 {offsets = [3, 0], sizes = [1, 64], strides = [1, 1]} : vector<8x64xf32> to vector<1x64xf32>
    %139 = vector.broadcast %138 : vector<1x64xf32> to vector<16x64xf32>
    %140 = arith.mulf %139, %65 : vector<16x64xf32>
    %141 = math.exp %140 : vector<16x64xf32>
    %142 = vector.extract_strided_slice %77 {offsets = [0, 3], sizes = [16, 1], strides = [1, 1]} : vector<16x8xf32> to vector<16x1xf32>
    %143 = vector.extract_strided_slice %74 {offsets = [3, 0], sizes = [1, 64], strides = [1, 1]} : vector<8x64xf32> to vector<1x64xf32>
    %144 = vector.broadcast %142 : vector<16x1xf32> to vector<16x64xf32>
    %145 = vector.broadcast %143 : vector<1x64xf32> to vector<16x64xf32>
    %146 = arith.mulf %144, %145 : vector<16x64xf32>
    %147 = arith.mulf %141, %129 : vector<16x64xf32>
    %148 = arith.addf %147, %146 : vector<16x64xf32>
    %149 = vector.extract_strided_slice %80 {offsets = [0, 3], sizes = [16, 1], strides = [1, 1]} : vector<16x8xf32> to vector<16x1xf32>
    %150 = vector.broadcast %149 : vector<16x1xf32> to vector<16x64xf32>
    %151 = arith.mulf %150, %148 : vector<16x64xf32>
    %cst_43 = arith.constant dense<0.000000e+00> : vector<64xf32>
    %152 = vector.multi_reduction <add>, %151, %cst_43 [0] : vector<16x64xf32> to vector<64xf32>
    %153 = vector.shape_cast %152 : vector<64xf32> to vector<1x64xf32>
    %154 = vector.extract_strided_slice %71 {offsets = [3, 0], sizes = [1, 64], strides = [1, 1]} : vector<8x64xf32> to vector<1x64xf32>
    %155 = arith.mulf %66, %154 : vector<1x64xf32>
    %156 = arith.addf %153, %155 : vector<1x64xf32>
    %157 = vector.extract_strided_slice %73 {offsets = [4, 0], sizes = [1, 64], strides = [1, 1]} : vector<8x64xf32> to vector<1x64xf32>
    %158 = vector.broadcast %157 : vector<1x64xf32> to vector<16x64xf32>
    %159 = arith.mulf %158, %65 : vector<16x64xf32>
    %160 = math.exp %159 : vector<16x64xf32>
    %161 = vector.extract_strided_slice %77 {offsets = [0, 4], sizes = [16, 1], strides = [1, 1]} : vector<16x8xf32> to vector<16x1xf32>
    %162 = vector.extract_strided_slice %74 {offsets = [4, 0], sizes = [1, 64], strides = [1, 1]} : vector<8x64xf32> to vector<1x64xf32>
    %163 = vector.broadcast %161 : vector<16x1xf32> to vector<16x64xf32>
    %164 = vector.broadcast %162 : vector<1x64xf32> to vector<16x64xf32>
    %165 = arith.mulf %163, %164 : vector<16x64xf32>
    %166 = arith.mulf %160, %148 : vector<16x64xf32>
    %167 = arith.addf %166, %165 : vector<16x64xf32>
    %168 = vector.extract_strided_slice %80 {offsets = [0, 4], sizes = [16, 1], strides = [1, 1]} : vector<16x8xf32> to vector<16x1xf32>
    %169 = vector.broadcast %168 : vector<16x1xf32> to vector<16x64xf32>
    %170 = arith.mulf %169, %167 : vector<16x64xf32>
    %cst_44 = arith.constant dense<0.000000e+00> : vector<64xf32>
    %171 = vector.multi_reduction <add>, %170, %cst_44 [0] : vector<16x64xf32> to vector<64xf32>
    %172 = vector.shape_cast %171 : vector<64xf32> to vector<1x64xf32>
    %173 = vector.extract_strided_slice %71 {offsets = [4, 0], sizes = [1, 64], strides = [1, 1]} : vector<8x64xf32> to vector<1x64xf32>
    %174 = arith.mulf %66, %173 : vector<1x64xf32>
    %175 = arith.addf %172, %174 : vector<1x64xf32>
    %176 = vector.extract_strided_slice %73 {offsets = [5, 0], sizes = [1, 64], strides = [1, 1]} : vector<8x64xf32> to vector<1x64xf32>
    %177 = vector.broadcast %176 : vector<1x64xf32> to vector<16x64xf32>
    %178 = arith.mulf %177, %65 : vector<16x64xf32>
    %179 = math.exp %178 : vector<16x64xf32>
    %180 = vector.extract_strided_slice %77 {offsets = [0, 5], sizes = [16, 1], strides = [1, 1]} : vector<16x8xf32> to vector<16x1xf32>
    %181 = vector.extract_strided_slice %74 {offsets = [5, 0], sizes = [1, 64], strides = [1, 1]} : vector<8x64xf32> to vector<1x64xf32>
    %182 = vector.broadcast %180 : vector<16x1xf32> to vector<16x64xf32>
    %183 = vector.broadcast %181 : vector<1x64xf32> to vector<16x64xf32>
    %184 = arith.mulf %182, %183 : vector<16x64xf32>
    %185 = arith.mulf %179, %167 : vector<16x64xf32>
    %186 = arith.addf %185, %184 : vector<16x64xf32>
    %187 = vector.extract_strided_slice %80 {offsets = [0, 5], sizes = [16, 1], strides = [1, 1]} : vector<16x8xf32> to vector<16x1xf32>
    %188 = vector.broadcast %187 : vector<16x1xf32> to vector<16x64xf32>
    %189 = arith.mulf %188, %186 : vector<16x64xf32>
    %cst_45 = arith.constant dense<0.000000e+00> : vector<64xf32>
    %190 = vector.multi_reduction <add>, %189, %cst_45 [0] : vector<16x64xf32> to vector<64xf32>
    %191 = vector.shape_cast %190 : vector<64xf32> to vector<1x64xf32>
    %192 = vector.extract_strided_slice %71 {offsets = [5, 0], sizes = [1, 64], strides = [1, 1]} : vector<8x64xf32> to vector<1x64xf32>
    %193 = arith.mulf %66, %192 : vector<1x64xf32>
    %194 = arith.addf %191, %193 : vector<1x64xf32>
    %195 = vector.extract_strided_slice %73 {offsets = [6, 0], sizes = [1, 64], strides = [1, 1]} : vector<8x64xf32> to vector<1x64xf32>
    %196 = vector.broadcast %195 : vector<1x64xf32> to vector<16x64xf32>
    %197 = arith.mulf %196, %65 : vector<16x64xf32>
    %198 = math.exp %197 : vector<16x64xf32>
    %199 = vector.extract_strided_slice %77 {offsets = [0, 6], sizes = [16, 1], strides = [1, 1]} : vector<16x8xf32> to vector<16x1xf32>
    %200 = vector.extract_strided_slice %74 {offsets = [6, 0], sizes = [1, 64], strides = [1, 1]} : vector<8x64xf32> to vector<1x64xf32>
    %201 = vector.broadcast %199 : vector<16x1xf32> to vector<16x64xf32>
    %202 = vector.broadcast %200 : vector<1x64xf32> to vector<16x64xf32>
    %203 = arith.mulf %201, %202 : vector<16x64xf32>
    %204 = arith.mulf %198, %186 : vector<16x64xf32>
    %205 = arith.addf %204, %203 : vector<16x64xf32>
    %206 = vector.extract_strided_slice %80 {offsets = [0, 6], sizes = [16, 1], strides = [1, 1]} : vector<16x8xf32> to vector<16x1xf32>
    %207 = vector.broadcast %206 : vector<16x1xf32> to vector<16x64xf32>
    %208 = arith.mulf %207, %205 : vector<16x64xf32>
    %cst_46 = arith.constant dense<0.000000e+00> : vector<64xf32>
    %209 = vector.multi_reduction <add>, %208, %cst_46 [0] : vector<16x64xf32> to vector<64xf32>
    %210 = vector.shape_cast %209 : vector<64xf32> to vector<1x64xf32>
    %211 = vector.extract_strided_slice %71 {offsets = [6, 0], sizes = [1, 64], strides = [1, 1]} : vector<8x64xf32> to vector<1x64xf32>
    %212 = arith.mulf %66, %211 : vector<1x64xf32>
    %213 = arith.addf %210, %212 : vector<1x64xf32>
    %214 = vector.extract_strided_slice %73 {offsets = [7, 0], sizes = [1, 64], strides = [1, 1]} : vector<8x64xf32> to vector<1x64xf32>
    %215 = vector.broadcast %214 : vector<1x64xf32> to vector<16x64xf32>
    %216 = arith.mulf %215, %65 : vector<16x64xf32>
    %217 = math.exp %216 : vector<16x64xf32>
    %218 = vector.extract_strided_slice %77 {offsets = [0, 7], sizes = [16, 1], strides = [1, 1]} : vector<16x8xf32> to vector<16x1xf32>
    %219 = vector.extract_strided_slice %74 {offsets = [7, 0], sizes = [1, 64], strides = [1, 1]} : vector<8x64xf32> to vector<1x64xf32>
    %220 = vector.broadcast %218 : vector<16x1xf32> to vector<16x64xf32>
    %221 = vector.broadcast %219 : vector<1x64xf32> to vector<16x64xf32>
    %222 = arith.mulf %220, %221 : vector<16x64xf32>
    %223 = arith.mulf %217, %205 : vector<16x64xf32>
    %224 = arith.addf %223, %222 : vector<16x64xf32>
    %225 = vector.extract_strided_slice %80 {offsets = [0, 7], sizes = [16, 1], strides = [1, 1]} : vector<16x8xf32> to vector<16x1xf32>
    %226 = vector.broadcast %225 : vector<16x1xf32> to vector<16x64xf32>
    %227 = arith.mulf %226, %224 : vector<16x64xf32>
    %cst_47 = arith.constant dense<0.000000e+00> : vector<64xf32>
    %228 = vector.multi_reduction <add>, %227, %cst_47 [0] : vector<16x64xf32> to vector<64xf32>
    %229 = vector.shape_cast %228 : vector<64xf32> to vector<1x64xf32>
    %230 = vector.extract_strided_slice %71 {offsets = [7, 0], sizes = [1, 64], strides = [1, 1]} : vector<8x64xf32> to vector<1x64xf32>
    %231 = arith.mulf %66, %230 : vector<1x64xf32>
    %232 = arith.addf %229, %231 : vector<1x64xf32>
    %233 = tpu.concatenate %99, %118, %137, %156, %175, %194, %213, %232 in 0 : vector<1x64xf32>, vector<1x64xf32>, vector<1x64xf32>, vector<1x64xf32>, vector<1x64xf32>, vector<1x64xf32>, vector<1x64xf32>, vector<1x64xf32> -> vector<8x64xf32>
    %c0_48 = arith.constant 0 : index
    %234 = arith.index_cast %69 : i32 to index
    %c0_49 = arith.constant 0 : index
    %235 = vector.load %arg9[%c0_48, %234, %c0_49] : memref<1x8x64xf32, #tpu.memory_space<vmem>>, vector<1x8x64xf32>
    %236 = vector.shape_cast %235 : vector<1x8x64xf32> to vector<8x64xf32>
    %237 = vector.shape_cast %233 : vector<8x64xf32> to vector<1x8x64xf32>
    tpu.vector_store %arg9[%c0_48, %234, %c0_49], %237 {strides = array<i32>} : memref<1x8x64xf32, #tpu.memory_space<vmem>>, vector<1x8x64xf32>,
    %c1_i32 = arith.constant 1 : i32
    %c0_50 = arith.constant 0 : index
    %c0_51 = arith.constant 0 : index
    %238 = vector.load %arg14[%c0_50, %c0_51] : memref<16x64xf32, #tpu.memory_space<vmem>>, vector<16x64xf32>
    tpu.vector_store %arg14[%c0_50, %c0_51], %224 {strides = array<i32>} : memref<16x64xf32, #tpu.memory_space<vmem>>, vector<16x64xf32>,
    return
  }
  func.func @transform_0(%arg0: i32, %arg1: i32) -> (i32, i32, i32) {
    %c0_i32 = arith.constant 0 : i32
    %c0_i32_0 = arith.constant 0 : i32
    return %arg0, %arg1, %c0_i32 : i32, i32, i32
  }
  func.func @transform_1(%arg0: i32, %arg1: i32) -> (i32, i32) {
    %c0_i32 = arith.constant 0 : i32
    %c0_i32_0 = arith.constant 0 : i32
    %c0_i32_1 = arith.constant 0 : i32
    return %c0_i32, %c0_i32_0 : i32, i32
  }
  func.func @transform_2(%arg0: i32, %arg1: i32) -> (i32, i32) {
    %c0_i32 = arith.constant 0 : i32
    %c0_i32_0 = arith.constant 0 : i32
    %c0_i32_1 = arith.constant 0 : i32
    return %c0_i32, %c0_i32_0 : i32, i32
  }
  func.func @transform_3(%arg0: i32, %arg1: i32) -> (i32, i32) {
    %c0_i32 = arith.constant 0 : i32
    %c0_i32_0 = arith.constant 0 : i32
    %c0_i32_1 = arith.constant 0 : i32
    return %c0_i32, %c0_i32_0 : i32, i32
  }
  func.func @transform_4(%arg0: i32, %arg1: i32) -> (i32, i32) {
    %c0_i32 = arith.constant 0 : i32
    %c0_i32_0 = arith.constant 0 : i32
    %c0_i32_1 = arith.constant 0 : i32
    return %c0_i32, %c0_i32_0 : i32, i32
  }
  func.func @transform_5(%arg0: i32, %arg1: i32) -> (i32, i32) {
    %c0_i32 = arith.constant 0 : i32
    %c0_i32_0 = arith.constant 0 : i32
    %c0_i32_1 = arith.constant 0 : i32
    return %c0_i32, %c0_i32_0 : i32, i32
  }
  func.func @transform_6(%arg0: i32, %arg1: i32) -> (i32, i32) {
    %c0_i32 = arith.constant 0 : i32
    %c0_i32_0 = arith.constant 0 : i32
    %c0_i32_1 = arith.constant 0 : i32
    return %c0_i32, %c0_i32_0 : i32, i32
  }
  func.func @transform_7(%arg0: i32, %arg1: i32) -> (i32, i32, i32) {
    %c0_i32 = arith.constant 0 : i32
    %c0_i32_0 = arith.constant 0 : i32
    return %arg0, %arg1, %c0_i32 : i32, i32, i32
  }
}

module attributes {stable_mosaic.version = 11 : i64} {
  func.func @_rmsnorm_matmul_kernel(%arg0: i32, %arg1: memref<16x32xf32, #tpu.memory_space<vmem>>, %arg2: memref<1x32xf32, #tpu.memory_space<vmem>>, %arg3: memref<32x64xbf16, #tpu.memory_space<vmem>>, %arg4: memref<16x64xf32, #tpu.memory_space<vmem>>) attributes {dimension_semantics = [#tpu.dimension_semantics<parallel>], iteration_bounds = array<i64: 1>, scalar_prefetch = 0 : i64, scratch_operands = 0 : i64, tpu.core_type = #tpu.core_type<tc>, window_params = [{transform_indices = @transform_0, window_bounds = array<i64: 16, 32>}, {pipeline_mode = #tpu.pipeline_mode<synchronous>, transform_indices = @transform_1, window_bounds = array<i64: 1, 32>}, {pipeline_mode = #tpu.pipeline_mode<synchronous>, transform_indices = @transform_2, window_bounds = array<i64: 32, 64>}, {transform_indices = @transform_3, window_bounds = array<i64: 16, 64>}]} {
    %c0 = arith.constant 0 : index
    %c0_0 = arith.constant 0 : index
    %0 = vector.load %arg1[%c0, %c0_0] : memref<16x32xf32, #tpu.memory_space<vmem>>, vector<16x32xf32>
    %1 = arith.mulf %0, %0 : vector<16x32xf32>
    %cst = arith.constant dense<0.000000e+00> : vector<16xf32>
    %2 = vector.multi_reduction <add>, %1, %cst [1] : vector<16x32xf32> to vector<16xf32>
    %3 = vector.shape_cast %2 : vector<16xf32> to vector<16x1xf32>
    %cst_1 = arith.constant 3.200000e+01 : f32
    %4 = vector.broadcast %cst_1 : f32 to vector<16x1xf32>
    %5 = arith.divf %3, %4 : vector<16x1xf32>
    %cst_2 = arith.constant 9.99999974E-6 : f32
    %6 = vector.broadcast %cst_2 : f32 to vector<16x1xf32>
    %7 = arith.addf %5, %6 : vector<16x1xf32>
    %8 = math.rsqrt %7 : vector<16x1xf32>
    %9 = vector.broadcast %8 : vector<16x1xf32> to vector<16x32xf32>
    %10 = arith.mulf %0, %9 : vector<16x32xf32>
    %c0_3 = arith.constant 0 : index
    %c0_4 = arith.constant 0 : index
    %11 = vector.load %arg2[%c0_3, %c0_4] : memref<1x32xf32, #tpu.memory_space<vmem>>, vector<1x32xf32>
    %12 = vector.broadcast %11 : vector<1x32xf32> to vector<16x32xf32>
    %13 = arith.mulf %10, %12 : vector<16x32xf32>
    %14 = arith.truncf %13 : vector<16x32xf32> to vector<16x32xbf16>
    %c0_5 = arith.constant 0 : index
    %c0_6 = arith.constant 0 : index
    %15 = vector.load %arg3[%c0_5, %c0_6] : memref<32x64xbf16, #tpu.memory_space<vmem>>, vector<32x64xbf16>
    %cst_7 = arith.constant dense<0.000000e+00> : vector<16x64xf32>
    %16 = tpu.matmul %14, %15, %cst_7 {dimension_numbers = #tpu.dot_dimension_numbers<[1], [0], [0], [1], [0, 0, 1, 1], [], []>} : vector<16x32xbf16>, vector<32x64xbf16>, vector<16x64xf32> -> vector<16x64xf32>
    %c0_8 = arith.constant 0 : index
    %c0_9 = arith.constant 0 : index
    %17 = vector.load %arg4[%c0_8, %c0_9] : memref<16x64xf32, #tpu.memory_space<vmem>>, vector<16x64xf32>
    tpu.vector_store %arg4[%c0_8, %c0_9], %16 {strides = array<i32>} : memref<16x64xf32, #tpu.memory_space<vmem>>, vector<16x64xf32>,
    return
  }
  func.func @transform_0(%arg0: i32) -> (i32, i32) {
    %c0_i32 = arith.constant 0 : i32
    %c0_i32_0 = arith.constant 0 : i32
    return %arg0, %c0_i32 : i32, i32
  }
  func.func @transform_1(%arg0: i32) -> (i32, i32) {
    %c0_i32 = arith.constant 0 : i32
    %c0_i32_0 = arith.constant 0 : i32
    %c0_i32_1 = arith.constant 0 : i32
    return %c0_i32, %c0_i32_0 : i32, i32
  }
  func.func @transform_2(%arg0: i32) -> (i32, i32) {
    %c0_i32 = arith.constant 0 : i32
    %c0_i32_0 = arith.constant 0 : i32
    %c0_i32_1 = arith.constant 0 : i32
    return %c0_i32, %c0_i32_0 : i32, i32
  }
  func.func @transform_3(%arg0: i32) -> (i32, i32) {
    %c0_i32 = arith.constant 0 : i32
    %c0_i32_0 = arith.constant 0 : i32
    return %arg0, %c0_i32 : i32, i32
  }
}

</mosaic_0001>

<bundles_post_ra>
// kernel: mamba_forward.7
= control target key start
LH: loop header
LB: loop body
LE: loop exit
PB: predicated region body
PF: predicated region fallthrough
CT: control target
= control target key end

     0   :  { %10 = vsyncpa [#allocation3], 0  ;;  %s468_s0 = inlined_call_operand.hbm [shape: f32[16,32], index: 0, kind: input, shape index: {}]   ;;  %s469_s1 = inlined_call_operand.hbm [shape: f32[1,32], index: 1, kind: input, shape index: {}]   ;;  %s470_s2 = inlined_call_operand.hbm [shape: bf16[32,128], index: 2, kind: input, shape index: {}]   ;;  %s471_s3 = inlined_call_operand.hbm [shape: f32[16,64], index: 3, kind: output, shape index: {0}]   ;;  %s472_s4 = inlined_call_operand.hbm [shape: f32[16,64], index: 4, kind: output, shape index: {1}]  }
   0x1   :  { %11 = vsyncpa [#allocation6], 0 }
   0x2   :  { %12 = vsyncpa [#allocation4], 0 }
   0x3   :  { %13 = vsyncpa [#allocation10], 0  ;;  %s345_s15 = smov [#allocation5]   ;;  %s346_s17 = smov [#allocation2]  }
   0x4   :  { %s32_s16 = sshll.u32 %s345_s15, 4  ;;  %s19_s18 = sshll.u32 %s346_s17, 4  ;;  %s33_s16 = int_to_ptr.vmem [resolvable:$true] %s32_s16  ;;  %s381_s18 = int_to_ptr.vmem [resolvable:$true] %s19_s18 }
   0x5   :  { %s227_s21 = scalar_lea.hbm %s469_s1, 16 }
   0x6   :  { %p228_p0 = scmp.ne.s32.totalorder %s469_s1, %s227_s21  ;;  %p231_p1 = scmp.lt.u32.totalorder %s227_s21, %s469_s1 }
   0x8   :  { %p233_p2 = pnand %p231_p1, %p228_p0 }
   0xa   :  { %236 = shalt.err (!%p233_p2)
}
   0xb   :  { %s237_s26 = scalar_lea.vmem %s33_s16, 16  ;;  %s241_s27 = scalar_lea.vmem %s33_s16, 32 }
   0xc   :  { %p238_p3 = scmp.ne.s32.totalorder %s33_s16, %s237_s26  ;;  %p242_p4 = scmp.lt.s32.totalorder %s33_s16, %s33_s16 }
   0xd   :  { %p243_p5 = scmp.lt.s32.totalorder %s241_s27, %s237_s26 }
   0xf   :  { %p244_p6 = por %p243_p5, %p242_p4 }
  0x11   :  { %p245_p7 = pnand %p244_p6, %p238_p3 }
  0x13   :  { %248 = shalt.err (!%p245_p7)
}
  0x14   :  { %35 = dma.hbm_to_vmem [thread:$0]  %s469_s1, 16, %s33_s16, [#allocation6]  }
  0x15   :  { %s249_s6 = scalar_lea.hbm %s468_s0, 256 }
  0x16   :  { %p250_p8 = scmp.ne.s32.totalorder %s468_s0, %s249_s6  ;;  %p253_p9 = scmp.lt.u32.totalorder %s249_s6, %s468_s0 }
  0x18   :  { %p255_p10 = pnand %p253_p9, %p250_p8 }
  0x1a   :  { %258 = shalt.err (!%p255_p10)
}
  0x1b   :  { %s259_s11 = scalar_lea.vmem %s381_s18, 256  ;;  %p264_p12 = scmp.lt.s32.totalorder %s381_s18, %s381_s18 }
  0x1c   :  { %p260_p11 = scmp.ne.s32.totalorder %s381_s18, %s259_s11  ;;  %p265_p13 = scmp.lt.s32.totalorder %s259_s11, %s259_s11 }
  0x1e   :  { %p266_p0 = por %p265_p13, %p264_p12 }
  0x20   :  { %p267_p1 = pnand %p266_p0, %p260_p11 }
  0x22   :  { %270 = shalt.err (!%p267_p1)
}
  0x23   :  { %s347_s1 = smov 128   ;;  %s348_s12 = smov 8  }
  0x24   :  { %25 = dma.hbm_to_vmem [thread:$0]  %s468_s0, 256, %s381_s18, [#allocation3], %s347_s1, %s347_s1, %s348_s12  }
  0x25   :  { %s349_s15 = smov [#allocation7]   ;;  %s271_s20 = scalar_lea.hbm %s470_s2, 256 }
  0x26   :  { %s41_s16 = sshll.u32 %s349_s15, 4  ;;  %p272_p2 = scmp.ne.s32.totalorder %s470_s2, %s271_s20  ;;  %s42_s16 = int_to_ptr.vmem [resolvable:$true] %s41_s16 }
  0x27   :  { %p275_p3 = scmp.lt.u32.totalorder %s271_s20, %s470_s2 }
  0x29   :  { %p277_p4 = pnand %p275_p3, %p272_p2 }
  0x2b   :  { %280 = shalt.err (!%p277_p4)
}
  0x2c   :  { %s281_s25 = scalar_lea.vmem %s42_s16, 256  ;;  %p286_p6 = scmp.lt.s32.totalorder %s42_s16, %s42_s16 }
  0x2d   :  { %p282_p5 = scmp.ne.s32.totalorder %s42_s16, %s281_s25  ;;  %p287_p7 = scmp.lt.s32.totalorder %s281_s25, %s281_s25 }
  0x2f   :  { %p288_p8 = por %p287_p7, %p286_p6 }
  0x31   :  { %p289_p9 = pnand %p288_p8, %p282_p5 }
  0x33   :  { %292 = shalt.err (!%p289_p9)
}
  0x34   :  { %s350_s0 = smov 64   ;;  %s351_s18 = smov 4  }
  0x35   :  { %47 = dma.hbm_to_vmem [thread:$0]  %s470_s2, 256, %s42_s16, [#allocation6], %s350_s0, %s350_s0, %s351_s18  }
  0x36   :  { %337 = dma.done.wait [#allocation3], 256  }
  0x37   :  { %338 = vsyncadd [#allocation3], 4294967040 }
  0x38   :  { %339 = dma.done.wait [#allocation6], 272  }
  0x39   :  { %340 = vsyncadd [#allocation6], 4294967024  ;;  %v58_v0 = vld [vmem:[#allocation2] sm:$0xff]  ;;  %vm62_vm0 = vcmask 261120   ;;  %v59_v1 = vld [vmem:[#allocation2 + $0x8] sm:$0xff]  ;;  %v352_v7 = vmov 0.0  }
  0x3a   :  { %v60_v2 = vmul.f32 %v58_v0, %v58_v0  ;;  %v61_v3 = vmul.f32 %v59_v1, %v59_v1  ;;  %v221_v6 = vld [vmem:[#allocation7] sm:$0xff]   ;;  %202 = vmatprep.subr.bf16.mxu0 %v352_v7  ;;  %vm353_vm1 = vmmov 0   ;;  %v222_v8 = vld [vmem:[#allocation7 + $0x8] sm:$0xff]   ;;  %v195_v18 = vld [vmem:[#allocation5] ss:$0 sm:$0xff]  ;;  %vm148_vm2 = vcmask 523264  }
  0x3b   :  { %206 = vmatprep.mubr.msk.bf16.mxu0 %vm353_vm1, %v352_v7  ;;  %203 = vmatpush3.bf16.msra.mxu0 %v221_v6  ;;  %s354_s2 = smov [#allocation8]  }
  0x3c   :  { %v63_v4 = vsel %vm62_vm0, %v60_v2, 0.0  ;;  %v66_v5 = vsel %vm62_vm0, %v61_v3, 0.0  ;;  %204 = vmatprep.subr.bf16.mxu0 %v352_v7  ;;  %s166_s28 = sshll.u32 %s354_s2, 4  ;;  %s167_s28 = int_to_ptr.vmem [resolvable:$true] %s166_s28 }
  0x3d   :  { %64 = vadd.xlane.f32.xlu0 %v63_v4  ;;  %s293_s29 = scalar_lea.vmem %s167_s28, 256  ;;  %p298_p11 = scmp.lt.s32.totalorder %s167_s28, %s167_s28 }
  0x3e   :  { %p294_p10 = scmp.ne.s32.totalorder %s167_s28, %s293_s29  ;;  %p299_p12 = scmp.lt.s32.totalorder %s293_s29, %s293_s29 }
  0x3f   :  { %205 = vmatpush3.bf16.msra.mxu0 %v222_v8 }
  0x40   :  { %p300_p13 = por %p299_p12, %p298_p11 }
  0x41   :  { %67 = vadd.xlane.f32.xlu0 %v66_v5 }
  0x42   :  { %p301_p0 = pnand %p300_p13, %p294_p10 }
  0xca   :  { %v65_v9 = vpop.xlane.xlu0 %64 }
  0xcb   :  { %v70_v10 = vmul.f32 0.03125, %v65_v9 }
  0xcd   :  { %v72_v11 = vadd.f32 1e-05, %v70_v10 }
  0xce   :  { %v68_v12 = vpop.xlane.xlu0 %67 }
  0xcf   :  { %223 = vrsqrt.f32 %v72_v11  ;;  %v71_v13 = vmul.f32 0.03125, %v68_v12 }
  0xd1   :  { %v73_v14 = vadd.f32 1e-05, %v71_v13 }
  0xd3   :  { %225 = vrsqrt.f32 %v73_v14 }
  0xd9   :  { %v224_v15 = vpop.eup %223 }
  0xda   :  { %v76_v16 = vmul.f32 %v224_v15, %v58_v0 }
  0xdc   :  { %v85_v20 = vmul.f32 %v195_v18, %v76_v16 }
  0xdd   :  { %v226_v17 = vpop.eup %225 }
  0xde   :  { %v77_v19 = vmul.f32 %v226_v17, %v59_v1 }
  0xe0   :  { %v86_v21 = vmul.f32 %v195_v18, %v77_v19 }
  0xe2   :  { %v87_v22 = vpack.c.bf16 %v86_v21, %v85_v20 }
  0xe4   :  { %207 = vmatmul.mubr.msk.bf16.vlgmr.msra.gmra.mrb[0].mxu0 %vm62_vm0, %v87_v22 }
 0x1b7   :  { %v141_v23 = vpop.f32.mrb[0].mxu0 }
 0x1b8   :  { %149 = vst.msk [vmem:[#allocation8] sm:$0xff] %vm148_vm2, %v141_v23  ;;  %153 = vrot.lane.b32.xlu1 %v141_v23, %s350_s0  ;;  %v208_v24 = vpop.f32.mrb[1].mxu0 }
 0x1b9   :  { %v144_v25 = vpop.f32.mrb[2].mxu0 }
 0x1ba   :  { %150 = vst.msk [vmem:[#allocation8 + $0x8] sm:$0xff] %vm148_vm2, %v144_v25  ;;  %v209_v26 = vpop.f32.mrb[3].mxu0 }
 0x1bb   :  { %304 = shalt.err (!%p301_p0)
}
 0x1bc   :  { %s305_s6 = scalar_lea.hbm %s471_s3, 256 }
 0x1bd   :  { %p306_p1 = scmp.ne.s32.totalorder %s471_s3, %s305_s6  ;;  %p309_p2 = scmp.lt.u32.totalorder %s305_s6, %s471_s3 }
 0x1bf   :  { %p311_p3 = pnand %p309_p2, %p306_p1 }
 0x1c1   :  { %314 = shalt.err (!%p311_p3)
}
 0x1c2   :  { %172 = dma.vmem_to_hbm [thread:$0]  %s167_s28, 256, %s471_s3, [#allocation4], %s347_s1, %s347_s1, %s348_s12  }
 0x1c3   :  { %155 = vrot.lane.b32.xlu1 %v144_v25, %s350_s0  ;;  %s355_s14 = smov [#allocation9]  }
 0x1c4   :  { %s178_s15 = sshll.u32 %s355_s14, 4  ;;  %s179_s15 = int_to_ptr.vmem [resolvable:$true] %s178_s15 }
 0x1c5   :  { %s315_s16 = scalar_lea.vmem %s179_s15, 256  ;;  %p320_p5 = scmp.lt.s32.totalorder %s179_s15, %s179_s15 }
 0x1c6   :  { %p316_p4 = scmp.ne.s32.totalorder %s179_s15, %s315_s16  ;;  %p321_p6 = scmp.lt.s32.totalorder %s315_s16, %s315_s16 }
 0x1c8   :  { %p322_p7 = por %p321_p6, %p320_p5 }
 0x1ca   :  { %p323_p8 = pnand %p322_p7, %p316_p4 }
 0x22a   :  { %v154_v27 = vpop.permute.xlu1 %153 }
 0x22b   :  { %159 = vst.msk [vmem:[#allocation9] sm:$0xff] %vm148_vm2, %v154_v27 }
 0x235   :  { %v156_v28 = vpop.permute.xlu1 %155 }
 0x236   :  { %160 = vst.msk [vmem:[#allocation9 + $0x8] sm:$0xff] %vm148_vm2, %v156_v28 }
 0x237   :  { %326 = shalt.err (!%p323_p8)
}
 0x238   :  { %s327_s19 = scalar_lea.hbm %s472_s4, 256 }
 0x239   :  { %p328_p9 = scmp.ne.s32.totalorder %s472_s4, %s327_s19  ;;  %p331_p10 = scmp.lt.u32.totalorder %s327_s19, %s472_s4 }
 0x23b   :  { %p333_p11 = pnand %p331_p10, %p328_p9 }
 0x23d   :  { %336 = shalt.err (!%p333_p11)
}
 0x23e   :  { %184 = dma.vmem_to_hbm [thread:$0]  %s179_s15, 256, %s472_s4, [#allocation10], %s347_s1, %s347_s1, %s348_s12  }
 0x23f   :  { %341 = dma.done.wait [#allocation4], 256  }
 0x240   :  { %342 = vsyncadd [#allocation4], 4294967040 }
 0x241   :  { %343 = dma.done.wait [#allocation10], 256  }
 0x242   :  { %344 = vsyncadd [#allocation10], 4294967040 }
 0x243   :  { %191 = vsyncpa [#allocation3], 1 }
 0x244   :  { %192 = vsyncpa [#allocation6], 1 }
 0x245   :  { %193 = vsyncpa [#allocation4], 1 }
 0x246   :  { %194 = vsyncpa [#allocation10], 1 }

// kernel: mamba_forward.9
= control target key start
LH: loop header
LB: loop body
LE: loop exit
PB: predicated region body
PF: predicated region fallthrough
CT: control target
= control target key end

     0   :  { %9 = vsyncpa [#allocation3], 0  ;;  %s485_s0 = inlined_call_operand.hbm [shape: f32[16,64], index: 0, kind: input, shape index: {}]   ;;  %s486_s1 = inlined_call_operand.hbm [shape: f32[16,64], index: 1, kind: input, shape index: {}]   ;;  %s487_s2 = inlined_call_operand.hbm [shape: f32[16,32], index: 2, kind: input, shape index: {}]   ;;  %s488_s3 = inlined_call_operand.hbm [shape: bf16[64,32], index: 3, kind: input, shape index: {}]   ;;  %s489_s4 = inlined_call_operand.hbm [shape: f32[16,32], index: 4, kind: output, shape index: {}]  }
   0x1   :  { %10 = vsyncpa [#allocation6], 0 }
   0x2   :  { %11 = vsyncpa [#allocation9], 0 }
   0x3   :  { %12 = vsyncpa [#allocation4], 0  ;;  %s363_s15 = smov [#allocation5]   ;;  %s364_s17 = smov [#allocation2]  }
   0x4   :  { %s30_s16 = sshll.u32 %s363_s15, 4  ;;  %s18_s18 = sshll.u32 %s364_s17, 4  ;;  %s31_s16 = int_to_ptr.vmem [resolvable:$true] %s30_s16  ;;  %s399_s18 = int_to_ptr.vmem [resolvable:$true] %s18_s18 }
   0x5   :  { %s245_s21 = scalar_lea.hbm %s486_s1, 256 }
   0x6   :  { %p246_p0 = scmp.ne.s32.totalorder %s486_s1, %s245_s21  ;;  %p249_p1 = scmp.lt.u32.totalorder %s245_s21, %s486_s1 }
   0x8   :  { %p251_p2 = pnand %p249_p1, %p246_p0 }
   0xa   :  { %254 = shalt.err (!%p251_p2)
}
   0xb   :  { %s255_s26 = scalar_lea.vmem %s31_s16, 256  ;;  %p260_p4 = scmp.lt.s32.totalorder %s31_s16, %s31_s16 }
   0xc   :  { %p256_p3 = scmp.ne.s32.totalorder %s31_s16, %s255_s26  ;;  %p261_p5 = scmp.lt.s32.totalorder %s255_s26, %s255_s26 }
   0xe   :  { %p262_p6 = por %p261_p5, %p260_p4 }
  0x10   :  { %p263_p7 = pnand %p262_p6, %p256_p3 }
  0x12   :  { %266 = shalt.err (!%p263_p7)
}
  0x13   :  { %s365_s27 = smov 128   ;;  %s366_s28 = smov 8  }
  0x14   :  { %36 = dma.hbm_to_vmem [thread:$0]  %s486_s1, 256, %s31_s16, [#allocation6], %s365_s27, %s365_s27, %s366_s28  }
  0x15   :  { %s267_s7 = scalar_lea.hbm %s485_s0, 256 }
  0x16   :  { %p268_p8 = scmp.ne.s32.totalorder %s485_s0, %s267_s7  ;;  %p271_p9 = scmp.lt.u32.totalorder %s267_s7, %s485_s0 }
  0x18   :  { %p273_p10 = pnand %p271_p9, %p268_p8 }
  0x1a   :  { %276 = shalt.err (!%p273_p10)
}
  0x1b   :  { %s277_s12 = scalar_lea.vmem %s399_s18, 256  ;;  %p282_p12 = scmp.lt.s32.totalorder %s399_s18, %s399_s18 }
  0x1c   :  { %p278_p11 = scmp.ne.s32.totalorder %s399_s18, %s277_s12  ;;  %p283_p13 = scmp.lt.s32.totalorder %s277_s12, %s277_s12 }
  0x1e   :  { %p284_p0 = por %p283_p13, %p282_p12 }
  0x20   :  { %p285_p1 = pnand %p284_p0, %p278_p11 }
  0x22   :  { %288 = shalt.err (!%p285_p1)
}
  0x23   :  { %24 = dma.hbm_to_vmem [thread:$0]  %s485_s0, 256, %s399_s18, [#allocation3], %s365_s27, %s365_s27, %s366_s28  }
  0x24   :  { %s367_s14 = smov [#allocation7]   ;;  %s368_s16 = smov [#allocation8]  }
  0x25   :  { %s42_s15 = sshll.u32 %s367_s14, 4  ;;  %s54_s17 = sshll.u32 %s368_s16, 4  ;;  %s43_s15 = int_to_ptr.vmem [resolvable:$true] %s42_s15  ;;  %s436_s17 = int_to_ptr.vmem [resolvable:$true] %s54_s17 }
  0x26   :  { %s289_s21 = scalar_lea.hbm %s487_s2, 256 }
  0x27   :  { %p290_p2 = scmp.ne.s32.totalorder %s487_s2, %s289_s21  ;;  %p293_p3 = scmp.lt.u32.totalorder %s289_s21, %s487_s2 }
  0x29   :  { %p295_p4 = pnand %p293_p3, %p290_p2 }
  0x2b   :  { %298 = shalt.err (!%p295_p4)
}
  0x2c   :  { %s299_s0 = scalar_lea.vmem %s43_s15, 256  ;;  %p304_p6 = scmp.lt.s32.totalorder %s43_s15, %s43_s15 }
  0x2d   :  { %p300_p5 = scmp.ne.s32.totalorder %s43_s15, %s299_s0  ;;  %p305_p7 = scmp.lt.s32.totalorder %s299_s0, %s299_s0 }
  0x2f   :  { %p306_p8 = por %p305_p7, %p304_p6 }
  0x31   :  { %p307_p9 = pnand %p306_p8, %p300_p5 }
  0x33   :  { %310 = shalt.err (!%p307_p9)
}
  0x34   :  { %48 = dma.hbm_to_vmem [thread:$0]  %s487_s2, 256, %s43_s15, [#allocation6], %s365_s27, %s365_s27, %s366_s28  }
  0x35   :  { %s311_s5 = scalar_lea.hbm %s488_s3, 512 }
  0x36   :  { %p312_p10 = scmp.ne.s32.totalorder %s488_s3, %s311_s5  ;;  %p315_p11 = scmp.lt.u32.totalorder %s311_s5, %s488_s3 }
  0x38   :  { %p317_p12 = pnand %p315_p11, %p312_p10 }
  0x3a   :  { %320 = shalt.err (!%p317_p12)
}
  0x3b   :  { %s321_s10 = scalar_lea.vmem %s436_s17, 512  ;;  %p326_p0 = scmp.lt.s32.totalorder %s436_s17, %s436_s17 }
  0x3c   :  { %p322_p13 = scmp.ne.s32.totalorder %s436_s17, %s321_s10  ;;  %p327_p1 = scmp.lt.s32.totalorder %s321_s10, %s321_s10 }
  0x3e   :  { %p328_p2 = por %p327_p1, %p326_p0 }
  0x40   :  { %p329_p3 = pnand %p328_p2, %p322_p13 }
  0x42   :  { %332 = shalt.err (!%p329_p3)
}
  0x43   :  { %s369_s2 = smov 64   ;;  %s370_s11 = smov 4  }
  0x44   :  { %60 = dma.hbm_to_vmem [thread:$0]  %s488_s3, 512, %s436_s17, [#allocation9], %s369_s2, %s369_s2, %s370_s11  }
  0x45   :  { %355 = dma.done.wait [#allocation3], 256  }
  0x46   :  { %356 = vsyncadd [#allocation3], 4294967040 }
  0x47   :  { %357 = dma.done.wait [#allocation6], 512  }
  0x48   :  { %358 = vsyncadd [#allocation6], 4294966784 }
  0x49   :  { %359 = dma.done.wait [#allocation9], 512  }
  0x4a   :  { %360 = vsyncadd [#allocation9], 4294966784  ;;  %v371_v0 = vmov 0.0   ;;  %vm372_vm0 = vmmov 0   ;;  %v233_v1 = vld [vmem:[#allocation8] sm:$0xff]   ;;  %v234_v2 = vld [vmem:[#allocation8 + $0x8] sm:$0xff]  }
  0x4b   :  { %210 = vmatprep.subr.bf16.mxu0 %v371_v0  ;;  %218 = vmatprep.mubr.msk.bf16.mxu0 %vm372_vm0, %v371_v0  ;;  %v74_v3 = vld [vmem:[#allocation5] sm:$0xff]  ;;  %v75_v4 = vld [vmem:[#allocation5 + $0x8] sm:$0xff]  ;;  %v235_v7 = vld [vmem:[#allocation8 + $0x10] sm:$0xff]   ;;  %vm129_vm1 = vcmask 523264   ;;  %vm176_vm2 = vcmask 261120   ;;  %s373_s3 = smov [#allocation10]  }
  0x4c   :  { %211 = vmatpush3.bf16.msra.mxu0 %v233_v1  ;;  %v198_v5 = vmul.f32 -1.442695, %v74_v3  ;;  %v199_v6 = vmul.f32 -1.442695, %v75_v4  ;;  %v236_v8 = vld [vmem:[#allocation8 + $0x18] sm:$0xff]   ;;  %v76_v13 = vld [vmem:[#allocation2] sm:$0xff] }
  0x4d   :  { %212 = vmatprep.subr.bf16.mxu0 %v371_v0  ;;  %v77_v14 = vld [vmem:[#allocation2 + $0x8] sm:$0xff]  ;;  %v78_v15 = vmul.f32 %v76_v13, %v74_v3  ;;  %v95_v22 = vld [vmem:[#allocation7] sm:$0xff]  ;;  %s184_s13 = sshll.u32 %s373_s3, 4  ;;  %s185_s13 = int_to_ptr.vmem [resolvable:$true] %s184_s13 }
  0x4e   :  { %237 = vpow2.f32 %v198_v5  ;;  %v79_v16 = vmul.f32 %v77_v14, %v75_v4  ;;  %v96_v24 = vld [vmem:[#allocation7 + $0x8] sm:$0xff]  ;;  %s333_s14 = scalar_lea.vmem %s185_s13, 256  ;;  %p338_p5 = scmp.lt.s32.totalorder %s185_s13, %s185_s13 }
  0x4f   :  { %239 = vpow2.f32 %v199_v6  ;;  %p334_p4 = scmp.ne.s32.totalorder %s185_s13, %s333_s14  ;;  %p339_p6 = scmp.lt.s32.totalorder %s333_s14, %s333_s14 }
  0x50   :  { %213 = vmatpush3.bf16.msra.mxu0 %v234_v2 }
  0x51   :  { %214 = vmatprep.subr.bf16.mxu0 %v371_v0  ;;  %p340_p7 = por %p339_p6, %p338_p5 }
  0x53   :  { %p341_p8 = pnand %p340_p7, %p334_p4 }
  0x54   :  { %215 = vmatpush3.bf16.msra.mxu0 %v235_v7 }
  0x55   :  { %216 = vmatprep.subr.bf16.mxu0 %v371_v0 }
  0x58   :  { %217 = vmatpush3.bf16.msra.mxu0 %v236_v8  ;;  %v238_v9 = vpop.eup %237 }
  0x59   :  { %v240_v10 = vpop.eup %239  ;;  %v86_v11 = vadd.f32 1.0, %v238_v9 }
  0x5a   :  { %v87_v12 = vadd.f32 1.0, %v240_v10 }
  0x5b   :  { %241 = vrcp.f32 %v86_v11 }
  0x5c   :  { %243 = vrcp.f32 %v87_v12 }
  0x65   :  { %v242_v17 = vpop.eup %241 }
  0x66   :  { %v244_v18 = vpop.eup %243  ;;  %v92_v19 = vmul.f32 %v242_v17, %v78_v15 }
  0x67   :  { %v93_v20 = vmul.f32 %v244_v18, %v79_v16 }
  0x69   :  { %v94_v21 = vpack.c.bf16 %v93_v20, %v92_v19 }
  0x6b   :  { %219 = vmatmul.mubr.msk.bf16.vlgmr.msra.gmra.mrb[0].mxu0 %vm129_vm1, %v94_v21 }
 0x13e   :  { %v167_v23 = vpop.f32.mrb[0].mxu0 }
 0x13f   :  { %v174_v25 = vadd.f32 %v167_v23, %v95_v22  ;;  %v220_v26 = vpop.f32.mrb[1].mxu0 }
 0x140   :  { %v170_v27 = vpop.f32.mrb[2].mxu0 }
 0x141   :  { %v175_v28 = vadd.f32 %v170_v27, %v96_v24  ;;  %v221_v29 = vpop.f32.mrb[3].mxu0  ;;  %177 = vst.msk [vmem:[#allocation10] sm:$0xff] %vm176_vm2, %v174_v25 }
 0x143   :  { %178 = vst.msk [vmem:[#allocation10 + $0x8] sm:$0xff] %vm176_vm2, %v175_v28 }
 0x144   :  { %344 = shalt.err (!%p341_p8)
}
 0x145   :  { %s345_s17 = scalar_lea.hbm %s489_s4, 256 }
 0x146   :  { %p346_p9 = scmp.ne.s32.totalorder %s489_s4, %s345_s17  ;;  %p349_p10 = scmp.lt.u32.totalorder %s345_s17, %s489_s4 }
 0x148   :  { %p351_p11 = pnand %p349_p10, %p346_p9 }
 0x14a   :  { %354 = shalt.err (!%p351_p11)
}
 0x14b   :  { %190 = dma.vmem_to_hbm [thread:$0]  %s185_s13, 256, %s489_s4, [#allocation4], %s365_s27, %s365_s27, %s366_s28  }
 0x14c   :  { %361 = dma.done.wait [#allocation4], 256  }
 0x14d   :  { %362 = vsyncadd [#allocation4], 4294967040 }
 0x14e   :  { %194 = vsyncpa [#allocation3], 1 }
 0x14f   :  { %195 = vsyncpa [#allocation6], 1 }
 0x150   :  { %196 = vsyncpa [#allocation9], 1 }
 0x151   :  { %197 = vsyncpa [#allocation4], 1 }

// kernel: mamba_forward.13
= control target key start
LH: loop header
LB: loop body
LE: loop exit
PB: predicated region body
PF: predicated region fallthrough
CT: control target
= control target key end

     0   :  { %8 = vsyncpa [#allocation3], 0  ;;  %s385_s0 = inlined_call_operand.hbm [shape: f32[16,32], index: 0, kind: input, shape index: {}]   ;;  %s386_s1 = inlined_call_operand.hbm [shape: f32[1,32], index: 1, kind: input, shape index: {}]   ;;  %s387_s2 = inlined_call_operand.hbm [shape: bf16[32,64], index: 2, kind: input, shape index: {}]   ;;  %s388_s3 = inlined_call_operand.hbm [shape: f32[16,64], index: 3, kind: output, shape index: {}]  }
   0x1   :  { %9 = vsyncpa [#allocation6], 0 }
   0x2   :  { %10 = vsyncpa [#allocation4], 0  ;;  %s291_s12 = smov [#allocation5]   ;;  %s292_s14 = smov [#allocation2]  }
   0x3   :  { %s29_s13 = sshll.u32 %s291_s12, 4  ;;  %s16_s15 = sshll.u32 %s292_s14, 4  ;;  %s30_s13 = int_to_ptr.vmem [resolvable:$true] %s29_s13  ;;  %s321_s15 = int_to_ptr.vmem [resolvable:$true] %s16_s15 }
   0x4   :  { %s197_s18 = scalar_lea.hbm %s386_s1, 16 }
   0x5   :  { %p198_p0 = scmp.ne.s32.totalorder %s386_s1, %s197_s18  ;;  %p201_p1 = scmp.lt.u32.totalorder %s197_s18, %s386_s1 }
   0x7   :  { %p203_p2 = pnand %p201_p1, %p198_p0 }
   0x9   :  { %206 = shalt.err (!%p203_p2)
}
   0xa   :  { %s207_s23 = scalar_lea.vmem %s30_s13, 16  ;;  %s211_s24 = scalar_lea.vmem %s30_s13, 32 }
   0xb   :  { %p208_p3 = scmp.ne.s32.totalorder %s30_s13, %s207_s23  ;;  %p212_p4 = scmp.lt.s32.totalorder %s30_s13, %s30_s13 }
   0xc   :  { %p213_p5 = scmp.lt.s32.totalorder %s211_s24, %s207_s23 }
   0xe   :  { %p214_p6 = por %p213_p5, %p212_p4 }
  0x10   :  { %p215_p7 = pnand %p214_p6, %p208_p3 }
  0x12   :  { %218 = shalt.err (!%p215_p7)
}
  0x13   :  { %32 = dma.hbm_to_vmem [thread:$0]  %s386_s1, 16, %s30_s13, [#allocation6]  }
  0x14   :  { %s219_s29 = scalar_lea.hbm %s385_s0, 256 }
  0x15   :  { %p220_p8 = scmp.ne.s32.totalorder %s385_s0, %s219_s29  ;;  %p223_p9 = scmp.lt.u32.totalorder %s219_s29, %s385_s0 }
  0x17   :  { %p225_p10 = pnand %p223_p9, %p220_p8 }
  0x19   :  { %228 = shalt.err (!%p225_p10)
}
  0x1a   :  { %s229_s7 = scalar_lea.vmem %s321_s15, 256  ;;  %p234_p12 = scmp.lt.s32.totalorder %s321_s15, %s321_s15 }
  0x1b   :  { %p230_p11 = scmp.ne.s32.totalorder %s321_s15, %s229_s7  ;;  %p235_p13 = scmp.lt.s32.totalorder %s229_s7, %s229_s7 }
  0x1d   :  { %p236_p0 = por %p235_p13, %p234_p12 }
  0x1f   :  { %p237_p1 = pnand %p236_p0, %p230_p11 }
  0x21   :  { %240 = shalt.err (!%p237_p1)
}
  0x22   :  { %s293_s1 = smov 128   ;;  %s294_s8 = smov 8  }
  0x23   :  { %22 = dma.hbm_to_vmem [thread:$0]  %s385_s0, 256, %s321_s15, [#allocation3], %s293_s1, %s293_s1, %s294_s8  }
  0x24   :  { %s295_s11 = smov [#allocation7]   ;;  %s241_s16 = scalar_lea.hbm %s387_s2, 256 }
  0x25   :  { %s38_s12 = sshll.u32 %s295_s11, 4  ;;  %p242_p2 = scmp.ne.s32.totalorder %s387_s2, %s241_s16  ;;  %s39_s12 = int_to_ptr.vmem [resolvable:$true] %s38_s12 }
  0x26   :  { %p245_p3 = scmp.lt.u32.totalorder %s241_s16, %s387_s2 }
  0x28   :  { %p247_p4 = pnand %p245_p3, %p242_p2 }
  0x2a   :  { %250 = shalt.err (!%p247_p4)
}
  0x2b   :  { %s251_s21 = scalar_lea.vmem %s39_s12, 256  ;;  %p256_p6 = scmp.lt.s32.totalorder %s39_s12, %s39_s12 }
  0x2c   :  { %p252_p5 = scmp.ne.s32.totalorder %s39_s12, %s251_s21  ;;  %p257_p7 = scmp.lt.s32.totalorder %s251_s21, %s251_s21 }
  0x2e   :  { %p258_p8 = por %p257_p7, %p256_p6 }
  0x30   :  { %p259_p9 = pnand %p258_p8, %p252_p5 }
  0x32   :  { %262 = shalt.err (!%p259_p9)
}
  0x33   :  { %s296_s0 = smov 64   ;;  %s297_s15 = smov 4  }
  0x34   :  { %44 = dma.hbm_to_vmem [thread:$0]  %s387_s2, 256, %s39_s12, [#allocation6], %s296_s0, %s296_s0, %s297_s15  }
  0x35   :  { %285 = dma.done.wait [#allocation3], 256  }
  0x36   :  { %286 = vsyncadd [#allocation3], 4294967040 }
  0x37   :  { %287 = dma.done.wait [#allocation6], 272  }
  0x38   :  { %288 = vsyncadd [#allocation6], 4294967024  ;;  %v55_v0 = vld [vmem:[#allocation2] sm:$0xff]  ;;  %vm59_vm0 = vcmask 261120   ;;  %v56_v1 = vld [vmem:[#allocation2 + $0x8] sm:$0xff]  ;;  %v298_v7 = vmov 0.0  }
  0x39   :  { %v57_v2 = vmul.f32 %v55_v0, %v55_v0  ;;  %v58_v3 = vmul.f32 %v56_v1, %v56_v1  ;;  %v191_v6 = vld [vmem:[#allocation7] sm:$0xff]   ;;  %173 = vmatprep.subr.bf16.mxu0 %v298_v7  ;;  %vm299_vm1 = vmmov 0   ;;  %v192_v8 = vld [vmem:[#allocation7 + $0x8] sm:$0xff]   ;;  %v166_v18 = vld [vmem:[#allocation5] ss:$0 sm:$0xff]  ;;  %vm145_vm2 = vcmask 523264  }
  0x3a   :  { %177 = vmatprep.mubr.msk.bf16.mxu0 %vm299_vm1, %v298_v7  ;;  %174 = vmatpush3.bf16.msra.mxu0 %v191_v6  ;;  %s300_s2 = smov [#allocation8]  }
  0x3b   :  { %v60_v4 = vsel %vm59_vm0, %v57_v2, 0.0  ;;  %v63_v5 = vsel %vm59_vm0, %v58_v3, 0.0  ;;  %175 = vmatprep.subr.bf16.mxu0 %v298_v7  ;;  %s153_s24 = sshll.u32 %s300_s2, 4  ;;  %s154_s24 = int_to_ptr.vmem [resolvable:$true] %s153_s24 }
  0x3c   :  { %61 = vadd.xlane.f32.xlu0 %v60_v4  ;;  %s263_s25 = scalar_lea.vmem %s154_s24, 256  ;;  %p268_p11 = scmp.lt.s32.totalorder %s154_s24, %s154_s24 }
  0x3d   :  { %p264_p10 = scmp.ne.s32.totalorder %s154_s24, %s263_s25  ;;  %p269_p12 = scmp.lt.s32.totalorder %s263_s25, %s263_s25 }
  0x3e   :  { %176 = vmatpush3.bf16.msra.mxu0 %v192_v8 }
  0x3f   :  { %p270_p13 = por %p269_p12, %p268_p11 }
  0x40   :  { %64 = vadd.xlane.f32.xlu0 %v63_v5 }
  0x41   :  { %p271_p0 = pnand %p270_p13, %p264_p10 }
  0xc9   :  { %v62_v9 = vpop.xlane.xlu0 %61 }
  0xca   :  { %v67_v10 = vmul.f32 0.03125, %v62_v9 }
  0xcc   :  { %v69_v11 = vadd.f32 1e-05, %v67_v10 }
  0xcd   :  { %v65_v12 = vpop.xlane.xlu0 %64 }
  0xce   :  { %193 = vrsqrt.f32 %v69_v11  ;;  %v68_v13 = vmul.f32 0.03125, %v65_v12 }
  0xd0   :  { %v70_v14 = vadd.f32 1e-05, %v68_v13 }
  0xd2   :  { %195 = vrsqrt.f32 %v70_v14 }
  0xd8   :  { %v194_v15 = vpop.eup %193 }
  0xd9   :  { %v73_v16 = vmul.f32 %v194_v15, %v55_v0 }
  0xdb   :  { %v82_v20 = vmul.f32 %v166_v18, %v73_v16 }
  0xdc   :  { %v196_v17 = vpop.eup %195 }
  0xdd   :  { %v74_v19 = vmul.f32 %v196_v17, %v56_v1 }
  0xdf   :  { %v83_v21 = vmul.f32 %v166_v18, %v74_v19 }
  0xe1   :  { %v84_v22 = vpack.c.bf16 %v83_v21, %v82_v20 }
  0xe3   :  { %178 = vmatmul.mubr.msk.bf16.vlgmr.msra.gmra.mrb[0].mxu0 %vm59_vm0, %v84_v22 }
 0x1b6   :  { %v138_v23 = vpop.f32.mrb[0].mxu0 }
 0x1b7   :  { %146 = vst.msk [vmem:[#allocation8] sm:$0xff] %vm145_vm2, %v138_v23  ;;  %v179_v24 = vpop.f32.mrb[1].mxu0 }
 0x1b8   :  { %v141_v25 = vpop.f32.mrb[2].mxu0 }
 0x1b9   :  { %147 = vst.msk [vmem:[#allocation8 + $0x8] sm:$0xff] %vm145_vm2, %v141_v25  ;;  %v180_v26 = vpop.f32.mrb[3].mxu0 }
 0x1ba   :  { %274 = shalt.err (!%p271_p0)
}
 0x1bb   :  { %s275_s28 = scalar_lea.hbm %s388_s3, 256 }
 0x1bc   :  { %p276_p1 = scmp.ne.s32.totalorder %s388_s3, %s275_s28  ;;  %p279_p2 = scmp.lt.u32.totalorder %s275_s28, %s388_s3 }
 0x1be   :  { %p281_p3 = pnand %p279_p2, %p276_p1 }
 0x1c0   :  { %284 = shalt.err (!%p281_p3)
}
 0x1c1   :  { %159 = dma.vmem_to_hbm [thread:$0]  %s154_s24, 256, %s388_s3, [#allocation4], %s293_s1, %s293_s1, %s294_s8  }
 0x1c2   :  { %289 = dma.done.wait [#allocation4], 256  }
 0x1c3   :  { %290 = vsyncadd [#allocation4], 4294967040 }
 0x1c4   :  { %163 = vsyncpa [#allocation3], 1 }
 0x1c5   :  { %164 = vsyncpa [#allocation6], 1 }
 0x1c6   :  { %165 = vsyncpa [#allocation4], 1 }

// kernel: mamba_forward.8
= control target key start
LH: loop header
LB: loop body
LE: loop exit
PB: predicated region body
PF: predicated region fallthrough
CT: control target
= control target key end

     0   :  { %s2512_s0 = inlined_call_operand.hbm [shape: f32[2,8,64], index: 0, kind: input, shape index: {}]   ;;  %s2513_s1 = inlined_call_operand.hbm [shape: f32[4,64], index: 1, kind: input, shape index: {}]   ;;  %s2514_s2 = inlined_call_operand.hbm [shape: f32[1,64], index: 2, kind: input, shape index: {}]   ;;  %s2515_s3 = inlined_call_operand.hbm [shape: bf16[64,96], index: 3, kind: input, shape index: {}]   ;;  %s2516_s4 = inlined_call_operand.hbm [shape: f32[1,64], index: 4, kind: input, shape index: {}]   ;;  %s2517_s5 = inlined_call_operand.hbm [shape: f32[16,64], index: 5, kind: input, shape index: {}]   ;;  %s2518_s6 = inlined_call_operand.hbm [shape: f32[1,64], index: 6, kind: input, shape index: {}]   ;;  %s2519_s7 = inlined_call_operand.hbm [shape: f32[2,8,64], index: 7, kind: output, shape index: {}]  }
   0x1   :  { %2526 = sst [smem:[#allocation26_spill]] %s2513_s1 }
   0x2   :  { %2527 = sst [smem:[#allocation27_spill]] %s2515_s3 }
   0x3   :  { %2528 = sst [smem:[#allocation28_spill]] %s2519_s7 }
   0x4   :  { %12 = vsyncpa [#allocation9], 0 }
   0x5   :  { %14 = vsyncpa [#allocation9 + $0x1], 0 }
   0x6   :  { %15 = vsyncpa [#allocation12], 0 }
   0x7   :  { %16 = vsyncpa [#allocation15], 0 }
   0x8   :  { %17 = vsyncpa [#allocation18], 0 }
   0x9   :  { %18 = vsyncpa [#allocation10], 0 }
   0xa   :  { %20 = vsyncpa [#allocation10 + $0x1], 0  ;;  %s1938_s24 = smov 0   ;;  %s1940_s25 = smov 0  }
   0xb   :  { %s1942_s26 = smov 0   ;;  %s1944_s27 = smov 0  }
   0xc   :  { %s1946_s28 = smov 0   ;;  %s1948_s29 = smov 0  }
   0xd LB: > { %s2523_s30 = sadd.s32 4294967295, %s1870_s29   ;;  %p1308_p0 = scmp.ge.s32.totalorder %s1870_s29, 1  ;;  %s1870_s29 = sphi %s1948_s29, %s26_s29   ;;  %s1866_s28 = sphi %s1946_s28, %s2552_s28   ;;  %s1862_s27 = sphi %s1944_s27, %s2551_s27   ;;  %s1858_s26 = sphi %s1942_s26, %s2550_s26   ;;  %s1854_s25 = sphi %s1940_s25, %s2549_s25   ;;  %s1850_s24 = sphi %s1938_s24, %s2548_s24  }
   0xe   : > { %p1972_p1 = scmp.eq.s32.totalorder %s2523_s30, 0  ;;  %p225_p2 = scmp.lt.s32.totalorder %s1870_s29, 3 }
   0xf   : > { %s1872_s10 = smov [#allocation11]   ;;  %s1873_s12 = smov [#allocation14]  }
  0x10   : > { %s2529_s8 = scalar_select %p1972_p1, 1, 0 }
  0x11   : > { %p1977_p3 = pnand %p1308_p0, %p225_p2  ;;  %s238_s11 = sshll.u32 %s1872_s10, 4  ;;  %s239_s11 = int_to_ptr.vmem [resolvable:$true] %s238_s11 }
  0x12   : > { %s259_s13 = sshll.u32 %s1873_s12, 4  ;;  %s1874_s15 = smov [#allocation17]   ;;  %s1990_s13 = int_to_ptr.vmem [resolvable:$true] %s259_s13 }
  0x13   : > { %s2530_s9 = scalar_select %p1977_p3, 1, 0 }
  0x14   : > { %p1388_p5 = pneg %p1977_p3  ;;  %s1992_s16 = sshll.u32 %s1874_s15, 4  ;;  %s284_s16 = int_to_ptr.vmem [resolvable:$true] %s1992_s16 }
  0x15   : > { %s2532_s1 = sld [smem:[#allocation26_spill]] }
  0x16   : > { %p1986_p6 = pnand %p1388_p5, %p1972_p1 }
  0x18   : > { %p2002_p8 = pneg %p1986_p6 }
  0x1b   : > { %s1578_s19 = scalar_lea.hbm %s2532_s1, 64 }
  0x1c   : > { %p1579_p7 = scmp.ne.s32.totalorder %s2532_s1, %s1578_s19  ;;  %p1585_p11 = scmp.lt.u32.totalorder %s1578_s19, %s2532_s1 }
  0x1e   : > { %p1581_p9 = pnand %p2002_p8, %p1579_p7 }
  0x20   : > { %p1582_p10 = pneg %p1581_p9 }
  0x22   : > { %p1587_p12 = pnand %p1585_p11, %p1582_p10 }
  0x24   : > { %1590 = shalt.err (!%p1587_p12)
}
  0x25   : > { %s1591_s12 = scalar_lea.vmem %s239_s11, 64  ;;  %p1599_p5 = scmp.lt.s32.totalorder %s239_s11, %s239_s11 }
  0x26   : > { %p1592_p13 = scmp.ne.s32.totalorder %s239_s11, %s1591_s12  ;;  %p1600_p4 = scmp.lt.s32.totalorder %s1591_s12, %s1591_s12 }
  0x28   : > { %p1594_p0 = pnand %p1592_p13, %p2002_p8  ;;  %p1601_p3 = por %p1600_p4, %p1599_p5 }
  0x2a   : > { %p1595_p2 = pneg %p1594_p0 }
  0x2c   : > { %p1602_p1 = pnand %p1601_p3, %p1595_p2 }
  0x2e   : > { %1605 = shalt.err (!%p1602_p1)
}
  0x2f   : > { %1391 = dma.hbm_to_vmem [thread:$0]  (!%p1986_p6), %s2532_s1, 64, %s239_s11, [#allocation12]  }
  0x30   : > { %s2534_s3 = sld [smem:[#allocation27_spill]] }
  0x36   : > { %s1606_s20 = scalar_lea.hbm %s2534_s3, 512 }
  0x37   : > { %p1607_p7 = scmp.ne.s32.totalorder %s2534_s3, %s1606_s20  ;;  %p1613_p1 = scmp.lt.u32.totalorder %s1606_s20, %s2534_s3 }
  0x39   : > { %p1609_p9 = pnand %p1607_p7, %p2002_p8 }
  0x3b   : > { %p1610_p4 = pneg %p1609_p9 }
  0x3d   : > { %p1615_p3 = pnand %p1613_p1, %p1610_p4 }
  0x3f   : > { %1618 = shalt.err (!%p1615_p3)
}
  0x40   : > { %s1619_s11 = scalar_lea.vmem %s1990_s13, 512  ;;  %p1627_p13 = scmp.lt.s32.totalorder %s1990_s13, %s1990_s13 }
  0x41   : > { %p1620_p10 = scmp.ne.s32.totalorder %s1990_s13, %s1619_s11  ;;  %p1628_p0 = scmp.lt.s32.totalorder %s1619_s11, %s1619_s11 }
  0x43   : > { %p1622_p11 = pnand %p1620_p10, %p2002_p8  ;;  %p1629_p2 = por %p1628_p0, %p1627_p13 }
  0x45   : > { %p1623_p12 = pneg %p1622_p11 }
  0x47   : > { %p1630_p5 = pnand %p1629_p2, %p1623_p12 }
  0x49   : > { %1633 = shalt.err (!%p1630_p5)
}
  0x4a   : > { %s1875_s15 = smov 64   ;;  %s1876_s17 = smov 4  }
  0x4b   : > { %1397 = dma.hbm_to_vmem [thread:$0]  (!%p1986_p6), %s2534_s3, 512, %s1990_s13, [#allocation15], %s1875_s15, %s1875_s15, %s1876_s17  }
  0x4c   : > { %s1634_s23 = scalar_lea.hbm %s2517_s5, 256 }
  0x4d   : > { %p1635_p7 = scmp.ne.s32.totalorder %s2517_s5, %s1634_s23  ;;  %p1641_p1 = scmp.lt.u32.totalorder %s1634_s23, %s2517_s5 }
  0x4f   : > { %p1637_p9 = pnand %p1635_p7, %p2002_p8 }
  0x51   : > { %p1638_p4 = pneg %p1637_p9 }
  0x53   : > { %p1643_p3 = pnand %p1641_p1, %p1638_p4 }
  0x55   : > { %1646 = shalt.err (!%p1643_p3)
}
  0x56   : > { %s1647_s18 = scalar_lea.vmem %s284_s16, 256  ;;  %p1655_p13 = scmp.lt.s32.totalorder %s284_s16, %s284_s16 }
  0x57   : > { %p1648_p10 = scmp.ne.s32.totalorder %s284_s16, %s1647_s18  ;;  %p1656_p0 = scmp.lt.s32.totalorder %s1647_s18, %s1647_s18 }
  0x59   : > { %p1650_p11 = pnand %p1648_p10, %p2002_p8  ;;  %p1657_p2 = por %p1656_p0, %p1655_p13 }
  0x5b   : > { %p1651_p12 = pneg %p1650_p11 }
  0x5d   : > { %p1658_p5 = pnand %p1657_p2, %p1651_p12 }
  0x5f   : > { %1661 = shalt.err (!%p1658_p5)
}
  0x60   : > { %s1877_s13 = smov 128   ;;  %s1878_s15 = smov 8  }
  0x61   : > { %1403 = dma.hbm_to_vmem [thread:$0]  (!%p1986_p6), %s2517_s5, 256, %s284_s16, [#allocation18], %s1877_s13, %s1877_s13, %s1878_s15  }
  0x62   : > { %s1879_s19 = smov [#allocation13]   ;;  %s1880_s21 = smov [#allocation16]  }
  0x63   : > { %s249_s20 = sshll.u32 %s1879_s19, 4  ;;  %s273_s23 = sshll.u32 %s1880_s21, 4  ;;  %s250_s20 = int_to_ptr.vmem [resolvable:$true] %s249_s20  ;;  %s274_s23 = int_to_ptr.vmem [resolvable:$true] %s273_s23 }
  0x64   : > { %s1662_s11 = scalar_lea.hbm %s2514_s2, 16 }
  0x65   : > { %p1663_p7 = scmp.ne.s32.totalorder %s2514_s2, %s1662_s11  ;;  %p1669_p1 = scmp.lt.u32.totalorder %s1662_s11, %s2514_s2 }
  0x67   : > { %p1665_p9 = pnand %p1663_p7, %p2002_p8 }
  0x69   : > { %p1666_p4 = pneg %p1665_p9 }
  0x6b   : > { %p1671_p3 = pnand %p1669_p1, %p1666_p4 }
  0x6d   : > { %1674 = shalt.err (!%p1671_p3)
}
  0x6e   : > { %s1675_s16 = scalar_lea.vmem %s250_s20, 16  ;;  %s1682_s13 = scalar_lea.vmem %s250_s20, 32 }
  0x6f   : > { %p1676_p10 = scmp.ne.s32.totalorder %s250_s20, %s1675_s16  ;;  %p1683_p13 = scmp.lt.s32.totalorder %s250_s20, %s250_s20 }
  0x70   : > { %p1684_p0 = scmp.lt.s32.totalorder %s1682_s13, %s1675_s16 }
  0x71   : > { %p1678_p11 = pnand %p1676_p10, %p2002_p8 }
  0x72   : > { %p1685_p2 = por %p1684_p0, %p1683_p13 }
  0x73   : > { %p1679_p12 = pneg %p1678_p11 }
  0x75   : > { %p1686_p5 = pnand %p1685_p2, %p1679_p12 }
  0x77   : > { %1689 = shalt.err (!%p1686_p5)
}
  0x78   : > { %1394 = dma.hbm_to_vmem [thread:$0]  (!%p1986_p6), %s2514_s2, 16, %s250_s20, [#allocation12]  }
  0x79   : > { %s1690_s30 = scalar_lea.hbm %s2516_s4, 16 }
  0x7a   : > { %p1691_p7 = scmp.ne.s32.totalorder %s2516_s4, %s1690_s30  ;;  %p1697_p1 = scmp.lt.u32.totalorder %s1690_s30, %s2516_s4 }
  0x7c   : > { %p1693_p9 = pnand %p1691_p7, %p2002_p8 }
  0x7e   : > { %p1694_p4 = pneg %p1693_p9 }
  0x80   : > { %p1699_p3 = pnand %p1697_p1, %p1694_p4 }
  0x82   : > { %1702 = shalt.err (!%p1699_p3)
}
  0x83   : > { %s1703_s12 = scalar_lea.vmem %s274_s23, 16  ;;  %s1710_s20 = scalar_lea.vmem %s274_s23, 32 }
  0x84   : > { %p1704_p10 = scmp.ne.s32.totalorder %s274_s23, %s1703_s12  ;;  %p1711_p13 = scmp.lt.s32.totalorder %s274_s23, %s274_s23 }
  0x85   : > { %p1712_p0 = scmp.lt.s32.totalorder %s1710_s20, %s1703_s12 }
  0x86   : > { %p1706_p11 = pnand %p1704_p10, %p2002_p8 }
  0x87   : > { %p1713_p2 = por %p1712_p0, %p1711_p13 }
  0x88   : > { %p1707_p12 = pneg %p1706_p11 }
  0x8a   : > { %p1714_p5 = pnand %p1713_p2, %p1707_p12 }
  0x8c   : > { %1717 = shalt.err (!%p1714_p5)
}
  0x8d   : > { %1400 = dma.hbm_to_vmem [thread:$0]  (!%p1986_p6), %s2516_s4, 16, %s274_s23, [#allocation15]  }
  0x8e   : > { %s1881_s16 = smov [#allocation19]   ;;  %s1718_s3 = scalar_lea.hbm %s2518_s6, 16 }
  0x8f   : > { %s297_s13 = sshll.u32 %s1881_s16, 4  ;;  %p1719_p7 = scmp.ne.s32.totalorder %s2518_s6, %s1718_s3  ;;  %s298_s13 = int_to_ptr.vmem [resolvable:$true] %s297_s13 }
  0x90   : > { %p1725_p1 = scmp.lt.u32.totalorder %s1718_s3, %s2518_s6 }
  0x91   : > { %p1721_p9 = pnand %p1719_p7, %p2002_p8 }
  0x93   : > { %p1722_p4 = pneg %p1721_p9 }
  0x95   : > { %p1727_p3 = pnand %p1725_p1, %p1722_p4 }
  0x97   : > { %1730 = shalt.err (!%p1727_p3)
}
  0x98   : > { %s1731_s23 = scalar_lea.vmem %s298_s13, 16  ;;  %s1738_s21 = scalar_lea.vmem %s298_s13, 32 }
  0x99   : > { %p1732_p10 = scmp.ne.s32.totalorder %s298_s13, %s1731_s23  ;;  %p1739_p13 = scmp.lt.s32.totalorder %s298_s13, %s298_s13 }
  0x9a   : > { %p1740_p0 = scmp.lt.s32.totalorder %s1738_s21, %s1731_s23 }
  0x9b   : > { %p1734_p11 = pnand %p1732_p10, %p2002_p8 }
  0x9c   : > { %p1741_p2 = por %p1740_p0, %p1739_p13 }
  0x9d   : > { %p1735_p12 = pneg %p1734_p11 }
  0x9f   : > { %p1742_p5 = pnand %p1741_p2, %p1735_p12 }
  0xa1   : > { %1745 = shalt.err (!%p1742_p5)
}
  0xa2   : > { %1406 = dma.hbm_to_vmem [thread:$0]  (!%p1986_p6), %s2518_s6, 16, %s298_s13, [#allocation18]  }
  0xa3   : > { %s1307_s22 = sadd.s32 4294967294, %s1870_s29   ;;  %s38_s20 = sadd.s32 1, %s1866_s28 }
  0xa4   : > { %p40_p8 = scmp.ge.s32.totalorder %s38_s20, 2  ;;  %s47_s14 = sadd.s32 1, %s1858_s26 }
  0xa5   : > { %p54_p7 = scmp.ne.s32.totalorder %s1858_s26, %s1854_s25  ;;  %p55_p9 = scmp.eq.s32.totalorder %s1870_s29, 0 }
  0xa6   : > { %s2554_s20 = smov (%p40_p8, %s38_s20), 0  ;;  %p60_p1 = scmp.ne.s32.totalorder %s1854_s25, %s1850_s24 }
  0xa7   : > { %p2122_p4 = por %p55_p9, %p54_p7  ;;  %s42_s18 = ssub.s32 %s1866_s28, %s2554_s20 }
  0xa8   : > { %s2536_s16 = sadd.s32 4294967295, %s1870_s29   ;;  %p45_p3 = scmp.eq.s32.totalorder %s42_s18, 0 }
  0xa9   : > { %p212_p6 = scmp.eq.s32.totalorder %s2536_s16, 1  ;;  %p2537_p10 = scmp.ne.s32.totalorder %s2529_s8, 0 }
  0xaa   : > { %p218_p13 = scmp.eq.s32.totalorder %s1307_s22, 1  ;;  %p1421_p2 = scmp.lt.s32.totalorder %s1870_s29, 2 }
  0xab   : > { %p2134_p11 = por %p2537_p10, %p60_p1  ;;  %p2138_p12 = por %p212_p6, %p54_p7 }
  0xac   : > { %s2143_s15 = scalar_select %p45_p3, %s1858_s26, %s47_s14  }
  0xad   : > { %s2539_s1 = scalar_select %p2138_p12, 1, 0 }
  0xae   : > { %p2145_p0 = por %p218_p13, %p60_p1  ;;  %s308_s7 = sand.u32 1, %s1858_s26  }
  0xaf   : > { %s1317_s30 = sshll.u32 %s1866_s28, 7  ;;  %s1316_s17 = sshll.u32 %s308_s7, 3 }
  0xb0   : > { %s2540_s3 = scalar_select %p2145_p0, 1, 0 }
  0xb1   : > { %s2155_s21 = scalar_lea.hbm %s2512_s0, %s1317_s30  ;;  %s312_s10 = scalar_lea.vmem [#allocation8], %s1316_s17 }
  0xb2   : > { %s320_s12 = sshll.u32 %s312_s10, 4  ;;  %p2159_p5 = pnand %p1421_p2, %p2122_p4  ;;  %s2163_s12 = int_to_ptr.vmem [resolvable:$true] %s320_s12 }
  0xb3   : > { %s309_s14 = scalar_lea.sflag [#allocation9], %s308_s7  ;;  %s1746_s18 = scalar_lea.hbm %s2155_s21, 128 }
  0xb4   : > { %p1747_p8 = scmp.ne.s32.totalorder %s2155_s21, %s1746_s18  ;;  %p1748_p7 = pneg %p2159_p5 }
  0xb5   : > { %s1751_s11 = scalar_lea.hbm %s2512_s0, 256  ;;  %p1752_p4 = scmp.lt.u32.totalorder %s2155_s21, %s2512_s0 }
  0xb6   : > { %p1749_p9 = pnand %p1748_p7, %p1747_p8  ;;  %p1753_p6 = scmp.lt.u32.totalorder %s1751_s11, %s1746_s18 }
  0xb7   : > { %p1755_p10 = scmp.lt.u32.totalorder %s1746_s18, %s2155_s21 }
  0xb8   : > { %p1750_p1 = pneg %p1749_p9  ;;  %p1754_p3 = por %p1753_p6, %p1752_p4 }
  0xba   : > { %p1756_p13 = por %p1755_p10, %p1754_p3 }
  0xbc   : > { %p1757_p2 = pnand %p1756_p13, %p1750_p1 }
  0xbe   : > { %1760 = shalt.err (!%p1757_p2)
}
  0xbf   : > { %s1761_s7 = scalar_lea.vmem %s2163_s12, 128  ;;  %s1882_s23 = smov [#allocation8]  }
  0xc0   : > { %p1762_p8 = scmp.ne.s32.totalorder %s2163_s12, %s1761_s7  ;;  %s1766_s10 = sshll.u32 %s1882_s23, 4  ;;  %s1767_s10 = int_to_ptr.vmem [resolvable:$false] %s1766_s10 }
  0xc1   : > { %s1768_s16 = scalar_lea.vmem %s1767_s10, 256  ;;  %p1769_p12 = scmp.lt.s32.totalorder %s2163_s12, %s1767_s10 }
  0xc2   : > { %p1764_p9 = pnand %p1762_p8, %p1748_p7  ;;  %p1770_p4 = scmp.lt.s32.totalorder %s1768_s16, %s1761_s7 }
  0xc4   : > { %p1765_p0 = pneg %p1764_p9  ;;  %p1771_p6 = por %p1770_p4, %p1769_p12 }
  0xc6   : > { %p1772_p3 = pnand %p1771_p6, %p1765_p0 }
  0xc8   : > { %1775 = shalt.err (!%p1772_p3)
}
  0xc9   : > { %1410 = dma.hbm_to_vmem [thread:$0]  (!%p2159_p5), %s2155_s21, 128, %s2163_s12, %s309_s14  }
  0xca   : > { %p2542_p1 = scmp.ne.s32.totalorder %s2530_s9, 0 }
  0xcb   : > { %s2193_s18 = sand.u32 (!%p2542_p1), 1, %s1854_s25  }
  0xcc   : > { %329 = sbr.rel (%p2542_p1) target bundleno = 1008 (0x3f0), region = 48  ;;  %s1319_s30 = sshll.u32 (!%p2542_p1), %s2193_s18, 3 }
  0xcd   : > { %s332_s11 = scalar_lea.sflag (!%p2542_p1), [#allocation9], %s2193_s18  ;;  %s335_s17 = scalar_lea.vmem (!%p2542_p1), [#allocation8], %s1319_s30 }
  0xd3   : > { %1829 = dma.done.wait (%p2134_p11), %s332_s11, 128  }
  0xd4   : > { %1831 = vsyncadd (%p2134_p11), %s332_s11, 4294967168  ;;  %p2543_p12 = scmp.ne.s32.totalorder %s2529_s8, 0 }
  0xd6   : > { %1833 = dma.done.wait (%p2543_p12), [#allocation12], 80  }
  0xd7   : > { %1835 = vsyncadd (%p2543_p12), [#allocation12], 4294967216 }
  0xd8   : > { %1837 = dma.done.wait (%p2543_p12), [#allocation15], 528  }
  0xd9   : > { %1839 = vsyncadd (%p2543_p12), [#allocation15], 4294966768 }
  0xda   : > { %1841 = dma.done.wait (%p2543_p12), [#allocation18], 272  }
  0xdb   : > { %1843 = vsyncadd (%p2543_p12), [#allocation18], 4294967024  ;;  %vm395_vm0 = vcmask 523264   ;;  %vm398_vm1 = vcmask 518144   ;;  %v1883_v0 = vmov 0.0   ;;  %vm1884_vm2 = vmmov 0  }
  0xdc   : > { %396 = vst.msk [vmem:[#allocation6] sm:$0xff] %vm395_vm0, %v1883_v0  ;;  %397 = vst.msk [vmem:[#allocation6 + $0x8] sm:$0xff] %vm395_vm0, %v1883_v0  ;;  %1348 = vmatprep.subr.bf16.mxu0 %v1883_v0  ;;  %1356 = vmatprep.mubr.msk.bf16.mxu0 %vm1884_vm2, %v1883_v0  ;;  %v1533_v1 = vld [vmem:[#allocation14] sm:$0xff]   ;;  %v1534_v2 = vld [vmem:[#allocation14 + $0x8] sm:$0xff]   ;;  %vm473_vm3 = vcmask 523269   ;;  %vm405_vm4 = vcmask 1042432  }
  0xdd   : > { %399 = vst.msk [vmem:[#allocation7] sm:$0x7] %vm398_vm1, %v1883_v0  ;;  %1349 = vmatpush3.bf16.msra.mxu0 %v1533_v1  ;;  %v400_v3 = vld [vmem:[%s335_s17] sm:$0xff]  ;;  %vm430_vm5 = vcmask 1046528   ;;  %v1328_v7 = vld [vmem:[#allocation11] ss:$0 sm:$0xff] }
  0xde   : > { %1350 = vmatprep.subr.bf16.mxu0 %v1883_v0  ;;  %v1535_v5 = vld [vmem:[#allocation14 + $0x10] sm:$0xff]   ;;  %v403_v6 = vrot.slane %v400_v3, 5  ;;  %v1329_v8 = vld [vmem:[#allocation11 + $0x1] ss:$0 sm:$0xff]  ;;  %v1330_v9 = vld [vmem:[#allocation11 + $0x2] ss:$0 sm:$0xff] }
  0xdf   : > { %v1331_v10 = vld [vmem:[#allocation11 + $0x3] ss:$0 sm:$0xff]  ;;  %v1338_v11 = vld [vmem:[#allocation16] ss:$0 sm:$0xff]  ;;  %v1327_v13 = vld [vmem:[#allocation13] ss:$0 sm:$0xff] }
  0xe0   : > { %v427_v14 = vmul.f32 %v1329_v8, %v403_v6  ;;  %v442_v15 = vmul.f32 %v1330_v9, %v403_v6  ;;  %v457_v16 = vmul.f32 %v1331_v10, %v403_v6  ;;  %s1885_s8 = smov 32   ;;  %vm445_vm6 = vcmask 1045504   ;;  %v1536_v24 = vld [vmem:[#allocation14 + $0x18] sm:$0xff]   ;;  %s1887_s9 = smov 112  }
  0xe1   : > { %1351 = vmatpush3.bf16.msra.mxu0 %v1534_v2  ;;  %566 = vrot.lane.b32.xlu0 %v1338_v11, %s1885_s8  ;;  %vm460_vm7 = vcmask 1044480   ;;  %v1886_v41 = vmov 0   ;;  %vm553_vm8 = vcmask 130048   ;;  %v1888_v63 = vmov 2   ;;  %s1889_s13 = smov 96   ;;  %s1340_s21 = sshll.u32 %s1862_s27, 7 }
  0xe2   : > { %1352 = vmatprep.subr.bf16.mxu0 %v1883_v0  ;;  %v432_v21 = vrot.slane %v427_v14, 1  ;;  %v447_v22 = vrot.slane %v442_v15, 2  ;;  %v462_v23 = vrot.slane %v457_v16, 3  ;;  %1501 = vset.pattern.permute.xlu0 %v1886_v41  ;;  %vm1141_vm11 = vcmask 1040384   ;;  %s389_s12 = scalar_lea.vmem [#allocation20], %s1319_s30  ;;  %s2544_s7 = sld [smem:[#allocation28_spill]] }
  0xe3   : > { %vm1143_vm12 = vcmask 1041408   ;;  %vm1146_vm13 = vcmask 1043456   ;;  %s1169_s22 = sshll.u32 %s389_s12, 4  ;;  %s1155_s27 = scalar_lea.sflag [#allocation10], %s2193_s18  ;;  %s2463_s22 = int_to_ptr.vmem [resolvable:$true] %s1169_s22 }
  0xe4   : > { %v401_v4 = vld [vmem:[#allocation7] sm:$0x7]  ;;  %s1776_s10 = scalar_lea.vmem %s2463_s22, 128  ;;  %p2545_p0 = scmp.ne.s32.totalorder %s2539_s1, 0 }
  0xe5   : > { %474 = vst.msk [vmem:[#allocation7 - $0x5] sm:$0xe0] %vm473_vm3, %v400_v3  ;;  %v406_v12 = vsel %vm405_vm4, %v401_v4, %v403_v6  ;;  %1353 = vmatpush3.bf16.msra.mxu0 %v1535_v5  ;;  %v1890_v3 = vmov 3   ;;  %v1891_v4 = vmov 1   ;;  %v1892_v5 = vmov 5   ;;  %p1777_p11 = scmp.ne.s32.totalorder %s2463_s22, %s1776_s10  ;;  %s1897_s16 = smov [#allocation20]  }
  0xe6   : > { %v419_v17 = vmul.f32 %v1328_v7, %v406_v12  ;;  %v426_v18 = vmul.f32 %v1329_v8, %v406_v12  ;;  %v441_v19 = vmul.f32 %v1330_v9, %v406_v12  ;;  %v456_v20 = vmul.f32 %v1331_v10, %v406_v12  ;;  %1354 = vmatprep.subr.bf16.mxu0 %v1883_v0  ;;  %s1780_s30 = sshll.u32 %s1897_s16, 4  ;;  %s1781_s30 = int_to_ptr.vmem [resolvable:$false] %s1780_s30 }
  0xe7   : > { %v1893_v6 = vmov 4   ;;  %v1894_v8 = vmov 6   ;;  %v1895_v9 = vmov 7   ;;  %v667_v12 = vlaneseq  ;;  %p1778_p5 = pnand %p1777_p11, %p2545_p0  ;;  %s1782_s11 = scalar_lea.vmem %s1781_s30, 256 }
  0xe8   : > { %v420_v25 = vadd.f32 %v1327_v13, %v419_v17  ;;  %v431_v26 = vrot.slane %v426_v18, 1  ;;  %v446_v27 = vrot.slane %v441_v19, 2  ;;  %v461_v28 = vrot.slane %v456_v20, 3  ;;  %v593_v17 = vld [vmem:[#allocation17] sm:$0xff]  ;;  %s2461_s23 = scalar_lea.hbm %s2544_s7, %s1340_s21  ;;  %p1783_p10 = scmp.lt.s32.totalorder %s2463_s22, %s1781_s30 }
  0xe9   : > { %1355 = vmatpush3.bf16.msra.mxu0 %v1536_v24  ;;  %v2244_v13 = vshrl.u32 %v667_v12, 7  ;;  %p1779_p7 = pneg %p1778_p5  ;;  %p1784_p13 = scmp.lt.s32.totalorder %s1782_s11, %s1776_s10 }
  0xea   : > { %v433_v29 = vsel %vm430_vm5, %v431_v26, %v432_v21  ;;  %v448_v30 = vsel %vm445_vm6, %v446_v27, %v447_v22  ;;  %v463_v32 = vsel %vm460_vm7, %v461_v28, %v462_v23 }
  0xeb   : > { %v435_v31 = vadd.f32 %v433_v29, %v420_v25  ;;  %v669_v14 = vsub.s32 0, %v2244_v13  ;;  %v722_v18 = vsub.s32 1, %v2244_v13  ;;  %v795_v21 = vsub.s32 2, %v2244_v13  ;;  %p1785_p2 = por %p1784_p13, %p1783_p10 }
  0xec   : > { %v846_v25 = vsub.s32 3, %v2244_v13  ;;  %v897_v29 = vsub.s32 4, %v2244_v13 }
  0xed   : > { %v450_v33 = vadd.f32 %v448_v30, %v435_v31  ;;  %v962_v31 = vsub.s32 5, %v2244_v13  ;;  %p1786_p8 = pnand %p1785_p2, %p1779_p7 }
  0xef   : > { %v465_v34 = vadd.f32 %v463_v32, %v450_v33 }
  0xf1   : > { %v1332_v35 = vmul.f32 -1.442695, %v465_v34 }
  0xf3   : > { %1538 = vpow2.f32 %v1332_v35 }
  0xfd   : > { %v1539_v36 = vpop.eup %1538 }
  0xfe   : > { %v469_v37 = vadd.f32 1.0, %v1539_v36 }
 0x100   : > { %1540 = vrcp.f32 %v469_v37  ;;  %v596_v37 = vld [vmem:[#allocation6] sm:$0xff] }
 0x10a   : > { %v1541_v38 = vpop.eup %1540 }
 0x10b   : > { %v472_v39 = vmul.f32 %v1541_v38, %v465_v34 }
 0x10d   : > { %v475_v40 = vpack.c.bf16 %v472_v39, %v472_v39  ;;  %552 = vst.msk [vmem:[#allocation2] sm:$0xff] %vm395_vm0, %v472_v39  ;;  %v1020_v39 = vsub.s32 6, %v2244_v13 }
 0x10f   : > { %1357 = vmatmul.mubr.msk.bf16.vlgmr.msra.gmra.mrb[0].mxu0 %vm395_vm0, %v475_v40 }
 0x114   : > { %v2256_v30 = vld [vmem:[#allocation2] sm:$0xff] }
 0x153   : > { %v567_v42 = vpop.permute.xlu0 %566 }
 0x1e2   : > { %v546_v43 = vpop.f32.mrb[0].mxu0 }
 0x1e3   : > { %554 = vst.msk [vmem:[#allocation4] sm:$0xff] %vm553_vm8, %v546_v43  ;;  %v569_v44 = vadd.f32 %v567_v42, %v546_v43  ;;  %556 = vrot.lane.b32.xlu0 %v546_v43, %s1887_s9  ;;  %v1358_v45 = vpop.f32.mrb[1].mxu0 }
 0x1e4   : > { %v549_v46 = vpop.f32.mrb[2].mxu0 }
 0x1e5   : > { %v573_v47 = vand.u32 2147483647, %v569_v44  ;;  %v1359_v48 = vpop.f32.mrb[3].mxu0  ;;  %v570_v61 = vmax.f32 %v569_v44, 0.0  ;;  %vm571_vm10 = vcmp.ne.f32.partialorder %v569_v44, %v569_v44 }
 0x1e6   : > { %v2275_v48 = vld [vmem:[#allocation17 + $0x8] sm:$0xff] }
 0x1e7   : > { %v574_v49 = vsub.f32 0.0, %v573_v47 }
 0x1e9   : > { %v575_v50 = vmul.f32 1.442695, %v574_v49 }
 0x1ea   : > { %v601_v51 = vld [vmem:[#allocation4] sm:$0xff] }
 0x1eb   : > { %1542 = vpow2.f32 %v575_v50  ;;  %602 = vxpose.xlu1.b32.start.end [1/1] (short) (narrow) %v601_v51, 16  ;;  %v1071_v50 = vsub.s32 7, %v2244_v13 }
 0x1f5   : > { %v1543_v52 = vpop.eup %1542 }
 0x1f6   : > { %v577_v53 = vadd.f32 1.0, %v1543_v52  ;;  %v580_v54 = vmul.f32 -0.5, %v1543_v52  ;;  %v583_v56 = vand.u32 2147483647, %v1543_v52 }
 0x1f8   : > { %1544 = vlog2.f32 %v577_v53  ;;  %v581_v55 = vadd.f32 1.0, %v580_v54  ;;  %vm584_vm9 = vcmp.lt.f32.partialorder %v583_v56, 0.0004427343 }
 0x1fa   : > { %v582_v59 = vmul.f32 %v1543_v52, %v581_v55 }
 0x202   : > { %v1545_v57 = vpop.eup %1544 }
 0x203   : > { %v579_v58 = vmul.f32 0.6931472, %v1545_v57 }
 0x205   : > { %v585_v60 = vsel %vm584_vm9, %v582_v59, %v579_v58 }
 0x206   : > { %v586_v62 = vadd.f32 %v585_v60, %v570_v61 }
 0x208   : > { %v587_v0 = vsel %vm571_vm10, %v569_v44, %v586_v62 }
 0x209   : > { %1503 = vset.pattern.permute.xlu1 %v1888_v63 }
 0x20d   : > { %589 = vrot.lane.b32.xlu1 %v587_v0, %s1889_s13 }
 0x255   : > { %v557_v1 = vpop.permute.xlu0 %556 }
 0x256   : > { %559 = vst.msk [vmem:[#allocation5] sm:$0xff] %vm553_vm8, %v557_v1 }
 0x25d   : > { %v634_v11 = vld [vmem:[#allocation5] sm:$0xff] }
 0x26b   : > { %v618_v2 = vpop.trf.xlu1 }
 0x26c   : > { %804 = vperm.xlu1 %1503, %v618_v2   ;;  %679 = vperm.xlu0 %1501, %v618_v2  }
 0x26f   : > { %v619_v7 = vpop.trf.xlu1 }
 0x270   : > { %1504 = vset.pattern.permute.xlu1 %v1890_v3  ;;  %1502 = vset.pattern.permute.xlu0 %v1891_v4 }
 0x271   : > { %855 = vperm.xlu1 %1504, %v618_v2   ;;  %731 = vperm.xlu0 %1502, %v618_v2  }
 0x275   : > { %1506 = vset.pattern.permute.xlu1 %v1892_v5  ;;  %1505 = vset.pattern.permute.xlu0 %v1893_v6 }
 0x276   : > { %971 = vperm.xlu1 %1506, %v618_v2   ;;  %906 = vperm.xlu0 %1505, %v618_v2  }
 0x27a   : > { %1507 = vset.pattern.permute.xlu1 %v1894_v8  ;;  %1511 = vset.pattern.permute.xlu0 %v1888_v63 }
 0x27b   : > { %1029 = vperm.xlu1 %1507, %v618_v2   ;;  %808 = vperm.xlu0 %1511, %v619_v7  }
 0x27f   : > { %1508 = vset.pattern.permute.xlu1 %v1895_v9  ;;  %1514 = vset.pattern.permute.xlu0 %v1892_v5  ;;  %v590_v10 = vpop.permute.xlu1 %589 }
 0x280   : > { %592 = vst.msk [vmem:[#allocation3] sm:$0xff] %vm395_vm0, %v590_v10  ;;  %1080 = vperm.xlu1 %1508, %v618_v2   ;;  %975 = vperm.xlu0 %1514, %v619_v7  }
 0x284   : > { %1509 = vset.pattern.permute.xlu1 %v1886_v41 }
 0x285   : > { %684 = vperm.xlu1 %1509, %v619_v7  }
 0x287   : > { %v599_v15 = vld [vmem:[#allocation3] sm:$0xff] }
 0x288   : > { %v670_v16 = vrot.slane %v599_v15, %v669_v14  ;;  %v723_v20 = vrot.slane %v599_v15, %v722_v18  ;;  %v2249_v24 = vrot.slane %v599_v15, %v795_v21  ;;  %v2253_v28 = vrot.slane %v599_v15, %v846_v25 }
 0x289   : > { %1510 = vset.pattern.permute.xlu1 %v1891_v4  ;;  %v2260_v32 = vmul.f32 %v599_v15, %v2256_v30  ;;  %v2263_v35 = vrot.slane %v599_v15, %v897_v29  ;;  %v2267_v38 = vrot.slane %v599_v15, %v962_v31  ;;  %v2279_v49 = vrot.slane %v599_v15, %v1020_v39 }
 0x28a   : > { %735 = vperm.xlu1 %1510, %v619_v7   ;;  %v671_v19 = vmul.f32 %v670_v16, %v593_v17  ;;  %v724_v23 = vmul.f32 %v723_v20, %v593_v17  ;;  %v797_v27 = vmul.f32 %v2249_v24, %v593_v17  ;;  %v848_v34 = vmul.f32 %v2253_v28, %v593_v17 }
 0x28b   : > { %v2271_v40 = vrot.slane %v2260_v32, %v669_v14  ;;  %v899_v43 = vmul.f32 %v2263_v35, %v593_v17  ;;  %v964_v53 = vmul.f32 %v2267_v38, %v593_v17  ;;  %v2286_v55 = vrot.slane %v2260_v32, %v722_v18 }
 0x28c   : > { %v673_v22 = vmul.f32 1.442695, %v671_v19  ;;  %v726_v26 = vmul.f32 1.442695, %v724_v23  ;;  %v799_v33 = vmul.f32 1.442695, %v797_v27  ;;  %v672_v56 = vmul.f32 %v670_v16, %v2275_v48 }
 0x28d   : > { %v850_v42 = vmul.f32 1.442695, %v848_v34  ;;  %v901_v52 = vmul.f32 1.442695, %v899_v43  ;;  %v966_v61 = vmul.f32 1.442695, %v964_v53  ;;  %v1022_v62 = vmul.f32 %v2279_v49, %v593_v17 }
 0x28e   : > { %1512 = vset.pattern.permute.xlu1 %v1890_v3  ;;  %1546 = vpow2.f32 %v673_v22  ;;  %v2294_v0 = vrot.slane %v599_v15, %v1071_v50  ;;  %v2297_v1 = vrot.slane %v2260_v32, %v795_v21  ;;  %v675_v10 = vmul.f32 1.442695, %v672_v56 }
 0x28f   : > { %859 = vperm.xlu1 %1512, %v619_v7   ;;  %1548 = vpow2.f32 %v726_v26  ;;  %v725_v12 = vmul.f32 %v723_v20, %v2275_v48  ;;  %v1024_v18 = vmul.f32 1.442695, %v1022_v62  ;;  %v2306_v15 = vrot.slane %v2260_v32, %v846_v25 }
 0x290   : > { %1550 = vpow2.f32 %v799_v33  ;;  %v1073_v19 = vmul.f32 %v2294_v0, %v593_v17  ;;  %v2317_v25 = vrot.slane %v2260_v32, %v897_v29  ;;  %v900_v56 = vmul.f32 %v2263_v35, %v2275_v48 }
 0x291   : > { %1552 = vpow2.f32 %v850_v42  ;;  %v728_v23 = vmul.f32 1.442695, %v725_v12  ;;  %v965_v35 = vmul.f32 %v2267_v38, %v2275_v48 }
 0x292   : > { %1554 = vpow2.f32 %v901_v52  ;;  %v1075_v34 = vmul.f32 1.442695, %v1073_v19 }
 0x293   : > { %1513 = vset.pattern.permute.xlu1 %v1893_v6  ;;  %1556 = vpow2.f32 %v966_v61  ;;  %v968_v38 = vmul.f32 1.442695, %v965_v35 }
 0x294   : > { %910 = vperm.xlu1 %1513, %v619_v7   ;;  %1558 = vpow2.f32 %v675_v10 }
 0x295   : > { %1560 = vpow2.f32 %v1024_v18 }
 0x296   : > { %1562 = vpow2.f32 %v728_v23 }
 0x297   : > { %1564 = vpow2.f32 %v1075_v34 }
 0x298   : > { %1515 = vset.pattern.permute.xlu1 %v1894_v8  ;;  %v1547_v36 = vpop.eup %1546 }
 0x299   : > { %1033 = vperm.xlu1 %1515, %v619_v7   ;;  %v693_v47 = vmul.f32 %v1547_v36, %v596_v37  ;;  %v1549_v54 = vpop.eup %1548  ;;  %v798_v36 = vmul.f32 %v2249_v24, %v2275_v48  ;;  %v981_v24 = vrot.slane %v2260_v32, %v962_v31 }
 0x29d   : > { %1516 = vset.pattern.permute.xlu1 %v1895_v9 }
 0x29e   : > { %635 = vxpose.xlu0.b32.start.end [1/1] (short) (narrow) %v634_v11, 16  ;;  %1084 = vperm.xlu1 %1516, %v619_v7   ;;  %v1551_v7 = vpop.eup %1550 }
 0x29f   : > { %v1553_v22 = vpop.eup %1552 }
 0x2a0   : > { %v1555_v37 = vpop.eup %1554 }
 0x2a1   : > { %v1557_v29 = vpop.eup %1556 }
 0x2a2   : > { %1517 = vset.pattern.permute.xlu1 %v1886_v41 }
 0x2c7   : > { %1518 = vset.pattern.permute.xlu0 %v1891_v4 }
 0x2eb   : > { %v680_v44 = vpop.permute.xlu0 %679  ;;  %v805_v45 = vpop.permute.xlu1 %804 }
 0x2ec   : > { %v691_v46 = vmul.f32 %v2271_v40, %v680_v44  ;;  %v815_v11 = vmul.f32 %v2297_v1, %v805_v45  ;;  %v801_v44 = vmul.f32 1.442695, %v798_v36  ;;  %v849_v45 = vmul.f32 %v2253_v28, %v2275_v48 }
 0x2ed   : > { %v1039_v28 = vrot.slane %v2260_v32, %v1020_v39  ;;  %v1090_v39 = vrot.slane %v2260_v32, %v1071_v50 }
 0x2ee   : > { %v2282_v51 = vadd.f32 %v693_v47, %v691_v46  ;;  %1566 = vpow2.f32 %v801_v44 }
 0x2f0   : > { %v732_v57 = vpop.permute.xlu0 %731  ;;  %v744_v58 = vmul.f32 %v1549_v54, %v2282_v51  ;;  %v856_v59 = vpop.permute.xlu1 %855 }
 0x2f1   : > { %v742_v60 = vmul.f32 %v2286_v55, %v732_v57  ;;  %v866_v26 = vmul.f32 %v2306_v15, %v856_v59  ;;  %v1559_v54 = vpop.eup %1558  ;;  %v597_v57 = vld [vmem:[#allocation6 + $0x8] sm:$0xff] }
 0x2f2   : > { %v1561_v31 = vpop.eup %1560 }
 0x2f3   : > { %v2299_v2 = vadd.f32 %v744_v58, %v742_v60  ;;  %v852_v58 = vmul.f32 1.442695, %v849_v45  ;;  %v1563_v12 = vpop.eup %1562 }
 0x2f4   : > { %v1565_v18 = vpop.eup %1564 }
 0x2f5   : > { %v817_v14 = vmul.f32 %v1551_v7, %v2299_v2  ;;  %v972_v16 = vpop.permute.xlu1 %971  ;;  %v907_v20 = vpop.permute.xlu0 %906  ;;  %v694_v7 = vmul.f32 %v1559_v54, %v597_v57  ;;  %1568 = vpow2.f32 %v852_v58 }
 0x2f6   : > { %v917_v42 = vmul.f32 %v2317_v25, %v907_v20  ;;  %v982_v52 = vmul.f32 %v981_v24, %v972_v16  ;;  %v1023_v20 = vmul.f32 %v2279_v49, %v2275_v48 }
 0x2f7   : > { %v2308_v21 = vadd.f32 %v817_v14, %v815_v11  ;;  %v903_v11 = vmul.f32 1.442695, %v900_v56 }
 0x2f9   : > { %v868_v27 = vmul.f32 %v1553_v22, %v2308_v21  ;;  %1570 = vpow2.f32 %v903_v11 }
 0x2fa   : > { %v1030_v33 = vpop.permute.xlu1 %1029  ;;  %1572 = vpow2.f32 %v968_v38 }
 0x2fb   : > { %v2314_v17 = vadd.f32 %v868_v27, %v866_v26  ;;  %v1040_v61 = vmul.f32 %v1039_v28, %v1030_v33  ;;  %v809_v27 = vpop.permute.xlu0 %808  ;;  %v1567_v33 = vpop.eup %1566 }
 0x2fc   : > { %v816_v34 = vmul.f32 %v2297_v1, %v809_v27 }
 0x2fd   : > { %v919_v43 = vmul.f32 %v1555_v37, %v2314_v17 }
 0x2ff   : > { %v1081_v46 = vpop.permute.xlu1 %1080  ;;  %v2326_v47 = vadd.f32 %v919_v43, %v917_v42  ;;  %v1074_v42 = vmul.f32 %v2294_v0, %v2275_v48  ;;  %v1569_v49 = vpop.eup %1568 }
 0x300   : > { %v1091_v19 = vmul.f32 %v1090_v39, %v1081_v46  ;;  %v976_v56 = vpop.permute.xlu0 %975 }
 0x301   : > { %v984_v53 = vmul.f32 %v1557_v29, %v2326_v47  ;;  %v1077_v46 = vmul.f32 1.442695, %v1074_v42  ;;  %v983_v58 = vmul.f32 %v981_v24, %v976_v56 }
 0x303   : > { %v2334_v59 = vadd.f32 %v984_v53, %v982_v52  ;;  %v1571_v1 = vpop.eup %1570 }
 0x304   : > { %v685_v60 = vpop.permute.xlu1 %684  ;;  %v1573_v0 = vpop.eup %1572 }
 0x305   : > { %v692_v62 = vmul.f32 %v2271_v40, %v685_v60  ;;  %v1042_v10 = vmul.f32 %v1561_v31, %v2334_v59 }
 0x307   : > { %v2343_v14 = vadd.f32 %v694_v7, %v692_v62  ;;  %v2345_v16 = vadd.f32 %v1042_v10, %v1040_v61 }
 0x309   : > { %v736_v40 = vpop.permute.xlu1 %735  ;;  %v745_v22 = vmul.f32 %v1563_v12, %v2343_v14  ;;  %v1093_v23 = vmul.f32 %v1565_v18, %v2345_v16 }
 0x30a   : > { %v743_v26 = vmul.f32 %v2286_v55, %v736_v40  ;;  %v1026_v55 = vmul.f32 1.442695, %v1023_v20 }
 0x30b   : > { %v2352_v32 = vadd.f32 %v1093_v23, %v1091_v19  ;;  %v1896_v19 = vmov 1966171168  }
 0x30c   : > { %v2354_v50 = vadd.f32 %v745_v22, %v743_v26  ;;  %1574 = vpow2.f32 %v1026_v55  ;;  %v769_v40 = vunpack.c.l.s4 %v1896_v19 }
 0x30d   : > { %1152 = vst.msk [vmem:[#allocation6] sm:$0xff] %vm395_vm0, %v2352_v32  ;;  %1576 = vpow2.f32 %v1077_v46 }
 0x30e   : > { %v818_v36 = vmul.f32 %v1567_v33, %v2354_v50  ;;  %v860_v37 = vpop.permute.xlu1 %859  ;;  %v770_v26 = vunpack.c.0.s8 %v769_v40 }
 0x30f   : > { %v867_v44 = vmul.f32 %v2306_v15, %v860_v37 }
 0x310   : > { %v2362_v43 = vadd.f32 %v818_v36, %v816_v34  ;;  %v2404_v34 = vsub.s32 %v770_v26, %v2244_v13 }
 0x312   : > { %v869_v45 = vmul.f32 %v1569_v49, %v2362_v43 }
 0x313   : > { %v911_v29 = vpop.permute.xlu1 %910 }
 0x314   : > { %v2366_v52 = vadd.f32 %v869_v45, %v867_v44  ;;  %v918_v53 = vmul.f32 %v2317_v25, %v911_v29  ;;  %v774_v45 = vrot.slane %v2256_v30, %v2404_v34 }
 0x316   : > { %v920_v54 = vmul.f32 %v1571_v1, %v2366_v52  ;;  %v1575_v60 = vpop.eup %1574  ;;  %v775_v1 = vcombine.high %v774_v45, %v774_v45 }
 0x317   : > { %v1577_v11 = vpop.eup %1576 }
 0x318   : > { %v2370_v48 = vadd.f32 %v920_v54, %v918_v53  ;;  %v1034_v57 = vpop.permute.xlu1 %1033 }
 0x319   : > { %v1041_v61 = vmul.f32 %v1039_v28, %v1034_v57 }
 0x31a   : > { %v985_v15 = vmul.f32 %v1573_v0, %v2370_v48 }
 0x31c   : > { %v2373_v31 = vadd.f32 %v985_v15, %v983_v58  ;;  %v782_v58 = vrot.slane %v774_v45, %v2404_v34 }
 0x31d   : > { %v1085_v10 = vpop.permute.xlu1 %1084 }
 0x31e   : > { %v651_v62 = vpop.trf.xlu0  ;;  %v1043_v7 = vmul.f32 %v1575_v60, %v2373_v31  ;;  %v1092_v35 = vmul.f32 %v1090_v39, %v1085_v10  ;;  %v789_v60 = vrot.slane %v775_v1, %v2404_v34 }
 0x31f   : > { %749 = vperm.xlu0 %1518, %v651_v62   ;;  %699 = vperm.xlu1 %1517, %v651_v62  }
 0x320   : > { %v2376_v25 = vadd.f32 %v1043_v7, %v1041_v61 }
 0x322   : > { %v1094_v12 = vmul.f32 %v1577_v11, %v2376_v25  ;;  %v652_v28 = vpop.trf.xlu0 }
 0x323   : > { %1521 = vset.pattern.permute.xlu0 %v1893_v6  ;;  %1519 = vset.pattern.permute.xlu1 %v1888_v63 }
 0x324   : > { %924 = vperm.xlu0 %1521, %v651_v62   ;;  %822 = vperm.xlu1 %1519, %v651_v62   ;;  %v2381_v24 = vadd.f32 %v1094_v12, %v1092_v35 }
 0x326   : > { %1153 = vst.msk [vmem:[#allocation6 + $0x8] sm:$0xff] %vm395_vm0, %v2381_v24 }
 0x328   : > { %1525 = vset.pattern.permute.xlu0 %v1888_v63  ;;  %1520 = vset.pattern.permute.xlu1 %v1890_v3 }
 0x329   : > { %826 = vperm.xlu0 %1525, %v652_v28   ;;  %873 = vperm.xlu1 %1520, %v651_v62  }
 0x32d   : > { %1527 = vset.pattern.permute.xlu0 %v1890_v3  ;;  %1522 = vset.pattern.permute.xlu1 %v1892_v5 }
 0x32e   : > { %877 = vperm.xlu0 %1527, %v652_v28   ;;  %989 = vperm.xlu1 %1522, %v651_v62  }
 0x332   : > { %1529 = vset.pattern.permute.xlu0 %v1892_v5  ;;  %1523 = vset.pattern.permute.xlu1 %v1894_v8 }
 0x333   : > { %993 = vperm.xlu0 %1529, %v652_v28   ;;  %1047 = vperm.xlu1 %1523, %v651_v62  }
 0x337   : > { %1531 = vset.pattern.permute.xlu0 %v1895_v9  ;;  %1524 = vset.pattern.permute.xlu1 %v1891_v4 }
 0x338   : > { %1098 = vperm.xlu0 %1531, %v651_v62   ;;  %753 = vperm.xlu1 %1524, %v652_v28  }
 0x33c   : > { %1526 = vset.pattern.permute.xlu1 %v1886_v41 }
 0x33d   : > { %704 = vperm.xlu1 %1526, %v652_v28  }
 0x341   : > { %1528 = vset.pattern.permute.xlu1 %v1893_v6 }
 0x342   : > { %928 = vperm.xlu1 %1528, %v652_v28  }
 0x346   : > { %1530 = vset.pattern.permute.xlu1 %v1894_v8 }
 0x347   : > { %1051 = vperm.xlu1 %1530, %v652_v28  }
 0x34b   : > { %1532 = vset.pattern.permute.xlu1 %v1895_v9 }
 0x34c   : > { %1102 = vperm.xlu1 %1532, %v652_v28  }
 0x39e   : > { %v750_v63 = vpop.permute.xlu0 %749  ;;  %v700_v3 = vpop.permute.xlu1 %699 }
 0x39f   : > { %v756_v37 = vmul.f32 %v750_v63, %v2299_v2 }
 0x3a1   : > { %v758_v13 = vsel %vm395_vm0, %v756_v37, 0.0 }
 0x3a3   : > { %v925_v5 = vpop.permute.xlu0 %924  ;;  %v823_v39 = vpop.permute.xlu1 %822 }
 0x3a4   : > { %v829_v6 = vmul.f32 %v823_v39, %v2308_v21  ;;  %v931_v62 = vmul.f32 %v925_v5, %v2326_v47  ;;  %v891_v39 = vcombine.high %v789_v60, %v789_v60  ;;  %v2430_v5 = vld [vmem:[#allocation19] sm:$0x1] }
 0x3a6   : > { %v831_v33 = vsel %vm395_vm0, %v829_v6, 0.0  ;;  %v933_v19 = vsel %vm395_vm0, %v931_v62, 0.0 }
 0x3a8   : > { %v827_v18 = vpop.permute.xlu0 %826  ;;  %v874_v4 = vpop.permute.xlu1 %873 }
 0x3a9   : > { %v830_v23 = vmul.f32 %v827_v18, %v2362_v43  ;;  %v880_v27 = vmul.f32 %v874_v4, %v2314_v17  ;;  %v942_v18 = vcombine.high %v2256_v30, %v2256_v30 }
 0x3ab   : > { %v832_v9 = vsel %vm395_vm0, %v830_v23, 0.0  ;;  %v882_v42 = vsel %vm395_vm0, %v880_v27, 0.0 }
 0x3ac   : > { %v833_v55 = vadd.f32 %v832_v9, %v831_v33  ;;  %v949_v9 = vrot.slane %v942_v18, %v2404_v34 }
 0x3ad   : > { %v878_v22 = vpop.permute.xlu0 %877  ;;  %v990_v41 = vpop.permute.xlu1 %989 }
 0x3ae   : > { %v881_v8 = vmul.f32 %v878_v22, %v2366_v52  ;;  %v996_v44 = vmul.f32 %v990_v41, %v2334_v59  ;;  %v834_v46 = vrot.slane %v833_v55, 4  ;;  %v707_v52 = vmul.f32 %v700_v3, %v2282_v51 }
 0x3af   : > { %v840_v3 = vcombine.high %v782_v58, %v782_v58 }
 0x3b0   : > { %v883_v36 = vsel %vm395_vm0, %v881_v8, 0.0  ;;  %v998_v56 = vsel %vm395_vm0, %v996_v44, 0.0  ;;  %v835_v15 = vadd.f32 %v834_v46, %v833_v55  ;;  %v893_v55 = vmul.f32 %v891_v39, %v2430_v5 }
 0x3b1   : > { %v884_v49 = vadd.f32 %v883_v36, %v882_v42  ;;  %v842_v37 = vmul.f32 %v840_v3, %v2430_v5  ;;  %v1007_v46 = vcombine.high %v949_v9, %v949_v9 }
 0x3b2   : > { %v1048_v38 = vpop.permute.xlu1 %1047  ;;  %v994_v20 = vpop.permute.xlu0 %993  ;;  %v836_v28 = vrot.slane %v835_v15, 2 }
 0x3b3   : > { %v997_v21 = vmul.f32 %v994_v20, %v2373_v31  ;;  %v885_v54 = vrot.slane %v884_v49, 4  ;;  %v709_v31 = vsel %vm395_vm0, %v707_v52, 0.0  ;;  %v1054_v23 = vmul.f32 %v1048_v38, %v2345_v16 }
 0x3b4   : > { %v837_v26 = vadd.f32 %v836_v28, %v835_v15 }
 0x3b5   : > { %v999_v29 = vsel %vm395_vm0, %v997_v21, 0.0  ;;  %v886_v7 = vadd.f32 %v885_v54, %v884_v49  ;;  %v1056_v16 = vsel %vm395_vm0, %v1054_v23, 0.0 }
 0x3b6   : > { %v1000_v0 = vadd.f32 %v999_v29, %v998_v56  ;;  %v838_v44 = vrot.slane %v837_v26, 1 }
 0x3b7   : > { %v754_v43 = vpop.permute.xlu1 %753  ;;  %v887_v40 = vrot.slane %v886_v7, 2  ;;  %v1099_v27 = vpop.permute.xlu0 %1098 }
 0x3b8   : > { %v757_v17 = vmul.f32 %v754_v43, %v2354_v50  ;;  %v1001_v11 = vrot.slane %v1000_v0, 4 }
 0x3b9   : > { %v888_v21 = vadd.f32 %v887_v40, %v886_v7 }
 0x3ba   : > { %v759_v2 = vsel %vm395_vm0, %v757_v17, 0.0  ;;  %v1002_v41 = vadd.f32 %v1001_v11, %v1000_v0  ;;  %v1105_v17 = vmul.f32 %v1099_v27, %v2352_v32  ;;  %v718_v0 = vmul.f32 %v2256_v30, %v2430_v5 }
 0x3bb   : > { %v760_v53 = vadd.f32 %v759_v2, %v758_v13  ;;  %v889_v1 = vrot.slane %v888_v21, 1 }
 0x3bc   : > { %v705_v59 = vpop.permute.xlu1 %704  ;;  %v1003_v43 = vrot.slane %v1002_v41, 2  ;;  %v1107_v58 = vsel %vm395_vm0, %v1105_v17, 0.0 }
 0x3bd   : > { %v761_v50 = vrot.slane %v760_v53, 4  ;;  %v708_v57 = vmul.f32 %v705_v59, %v2343_v14  ;;  %v890_v7 = vadd.f32 %v889_v1, %v888_v21 }
 0x3be   : > { %v1004_v59 = vadd.f32 %v1003_v43, %v1002_v41 }
 0x3bf   : > { %v762_v61 = vadd.f32 %v761_v50, %v760_v53  ;;  %v710_v51 = vsel %vm395_vm0, %v708_v57, 0.0  ;;  %v956_v53 = vrot.slane %v949_v9, %v2404_v34  ;;  %v839_v57 = vadd.f32 %v838_v44, %v837_v26 }
 0x3c0   : > { %v711_v10 = vadd.f32 %v710_v51, %v709_v31 }
 0x3c1   : > { %v763_v35 = vrot.slane %v762_v61, 2  ;;  %v929_v12 = vpop.permute.xlu1 %928 }
 0x3c2   : > { %v712_v63 = vrot.slane %v711_v10, 4  ;;  %v932_v14 = vmul.f32 %v929_v12, %v2370_v48 }
 0x3c3   : > { %v764_v4 = vadd.f32 %v763_v35, %v762_v61  ;;  %v1005_v35 = vrot.slane %v1004_v59, 1 }
 0x3c4   : > { %v713_v22 = vadd.f32 %v712_v63, %v711_v10  ;;  %v934_v47 = vsel %vm395_vm0, %v932_v14, 0.0  ;;  %v1065_v10 = vcombine.high %v956_v53, %v956_v53  ;;  %v843_v63 = vadd.f32 %v842_v37, %v839_v57 }
 0x3c5   : > { %v935_v6 = vadd.f32 %v934_v47, %v933_v19  ;;  %v765_v20 = vrot.slane %v764_v4, 1  ;;  %v1006_v47 = vadd.f32 %v1005_v35, %v1004_v59 }
 0x3c6   : > { %v714_v48 = vrot.slane %v713_v22, 2  ;;  %v1052_v8 = vpop.permute.xlu1 %1051 }
 0x3c7   : > { %v936_v33 = vrot.slane %v935_v6, 4  ;;  %v1055_v36 = vmul.f32 %v1052_v8, %v2376_v25  ;;  %v791_v25 = vmul.f32 %v789_v60, %v2430_v5  ;;  %v766_v29 = vadd.f32 %v765_v20, %v764_v4 }
 0x3c8   : > { %v715_v42 = vadd.f32 %v714_v48, %v713_v22  ;;  %v1014_v60 = vrot.slane %v1007_v46, %v2404_v34  ;;  %v1067_v4 = vmul.f32 %v1065_v10, %v2430_v5  ;;  %v894_v22 = vadd.f32 %v893_v55, %v890_v7 }
 0x3c9   : > { %v937_v38 = vadd.f32 %v936_v33, %v935_v6  ;;  %v1057_v49 = vsel %vm395_vm0, %v1055_v36, 0.0  ;;  %v792_v61 = vadd.f32 %v791_v25, %v766_v29  ;;  %v1124_v6 = vrot.slane %v843_v63, 6 }
 0x3ca   : > { %v716_v45 = vrot.slane %v715_v42, 1  ;;  %v1058_v13 = vadd.f32 %v1057_v49, %v1056_v16  ;;  %v1016_v3 = vmul.f32 %v1014_v60, %v2430_v5  ;;  %v1116_v40 = vcombine.high %v1014_v60, %v1014_v60 }
 0x3cb   : > { %v938_v2 = vrot.slane %v937_v38, 2  ;;  %v1103_v52 = vpop.permute.xlu1 %1102  ;;  %v1121_v39 = vrot.slane %v792_v61, 7  ;;  %v1127_v33 = vrot.slane %v894_v22, 5 }
 0x3cc   : > { %v1059_v54 = vrot.slane %v1058_v13, 4  ;;  %v1106_v56 = vmul.f32 %v1103_v52, %v2381_v24  ;;  %v717_v50 = vadd.f32 %v716_v45, %v715_v42  ;;  %v958_v24 = vmul.f32 %v956_v53, %v2430_v5 }
 0x3cd   : > { %v939_v32 = vadd.f32 %v938_v2, %v937_v38  ;;  %v1118_v20 = vmul.f32 %v1116_v40, %v2430_v5  ;;  %v1017_v36 = vadd.f32 %v1016_v3, %v1006_v47 }
 0x3ce   : > { %v1060_v15 = vadd.f32 %v1059_v54, %v1058_v13  ;;  %v1108_v31 = vsel %vm395_vm0, %v1106_v56, 0.0  ;;  %v719_v30 = vadd.f32 %v718_v0, %v717_v50 }
 0x3cf   : > { %v940_v51 = vrot.slane %v939_v32, 1  ;;  %v1109_v62 = vadd.f32 %v1108_v31, %v1107_v58  ;;  %v1133_v16 = vrot.slane %v1017_v36, 3 }
 0x3d0   : > { %v1061_v11 = vrot.slane %v1060_v15, 2  ;;  %v1142_v41 = vsel %vm1141_vm11, %v719_v30, %v1121_v39 }
 0x3d1   : > { %v941_v12 = vadd.f32 %v940_v51, %v939_v32  ;;  %v1110_v28 = vrot.slane %v1109_v62, 4  ;;  %v1144_v8 = vsel %vm1143_vm12, %v1142_v41, %v1124_v6 }
 0x3d2   : > { %v1062_v14 = vadd.f32 %v1061_v11, %v1060_v15  ;;  %v1145_v55 = vsel %vm405_vm4, %v1144_v8, %v1127_v33 }
 0x3d3   : > { %v1111_v34 = vadd.f32 %v1110_v28, %v1109_v62  ;;  %v959_v18 = vadd.f32 %v958_v24, %v941_v12 }
 0x3d4   : > { %v1063_v19 = vrot.slane %v1062_v14, 1 }
 0x3d5   : > { %v1112_v23 = vrot.slane %v1111_v34, 2  ;;  %v1130_v9 = vrot.slane %v959_v18, 4 }
 0x3d6   : > { %v1064_v26 = vadd.f32 %v1063_v19, %v1062_v14 }
 0x3d7   : > { %v1113_v48 = vadd.f32 %v1112_v23, %v1111_v34  ;;  %v1147_v43 = vsel %vm1146_vm13, %v1145_v55, %v1130_v9 }
 0x3d8   : > { %v1068_v27 = vadd.f32 %v1067_v4, %v1064_v26  ;;  %v1148_v5 = vsel %vm460_vm7, %v1147_v43, %v1133_v16 }
 0x3d9   : > { %v1114_v37 = vrot.slane %v1113_v48, 1 }
 0x3da   : > { %v1136_v42 = vrot.slane %v1068_v27, 2 }
 0x3db   : > { %v1115_v21 = vadd.f32 %v1114_v37, %v1113_v48 }
 0x3dc   : > { %v1149_v44 = vsel %vm445_vm6, %v1148_v5, %v1136_v42 }
 0x3dd   : > { %v1119_v38 = vadd.f32 %v1118_v20, %v1115_v21 }
 0x3df   : > { %v1139_v49 = vrot.slane %v1119_v38, 1 }
 0x3e1   : > { %v1150_v17 = vsel %vm430_vm5, %v1149_v44, %v1139_v49 }
 0x3e2   : > { %1151 = vst.msk [vmem:[%s389_s12] sm:$0xff] %vm395_vm0, %v1150_v17 }
 0x3e3   : > { %1789 = shalt.err (!%p1786_p8)
}
 0x3e4   : > { %s1790_s18 = scalar_lea.hbm %s2461_s23, 128  ;;  %s1794_s9 = scalar_lea.hbm %s2544_s7, 256 }
 0x3e5   : > { %p1791_p9 = scmp.ne.s32.totalorder %s2461_s23, %s1790_s18  ;;  %p1795_p3 = scmp.lt.u32.totalorder %s2461_s23, %s2544_s7 }
 0x3e6   : > { %p1796_p1 = scmp.lt.u32.totalorder %s1794_s9, %s1790_s18  ;;  %p1798_p11 = scmp.lt.u32.totalorder %s1790_s18, %s2461_s23 }
 0x3e7   : > { %p1792_p4 = pnand %p1791_p9, %p2545_p0 }
 0x3e8   : > { %p1797_p12 = por %p1796_p1, %p1795_p3 }
 0x3e9   : > { %p1793_p6 = pneg %p1792_p4 }
 0x3ea   : > { %p1799_p5 = por %p1798_p11, %p1797_p12 }
 0x3ec   : > { %p1800_p7 = pnand %p1799_p5, %p1793_p6 }
 0x3ee   : > { %1803 = shalt.err (!%p1800_p7)
}
 0x3ef   : > { %1386 = dma.vmem_to_hbm [thread:$0]  (%p2545_p0), %s2463_s22, 128, %s2461_s23, %s1155_s27  }
 0x3f0 PF: > { %s1181_s12 = sand.u32 1, %s1850_s24   ;;  %p2546_p10 = scmp.ne.s32.totalorder %s2540_s3, 0 }
 0x3f1   : > { %p2547_p13 = scmp.ge.s32.totalorder %s1870_s29, 2  ;;  %s1182_s14 = scalar_lea.sflag [#allocation10], %s1181_s12 }
 0x3f3   : > { %p1412_p2 = pnand %p2547_p13, %p2546_p10 }
 0x3f5   : > { %1845 = dma.done.wait (!%p1412_p2), %s1182_s14, 128  }
 0x3f6   : > { %1847 = vsyncadd (!%p1412_p2), %s1182_s14, 4294967168  ;;  %s26_s29 = sadd.s32 1, %s1870_s29   ;;  %s2548_s24 = smov %s1854_s25 }
 0x3f7   : > { %p23_p8 = scmp.ge.s32.totalorder %s26_s29, 4   ;;  %s2549_s25 = smov %s1858_s26 }
 0x3f8   : > { %s2550_s26 = smov %s2143_s15  ;;  %s2551_s27 = smov %s1866_s28 }
 0x3f9   : > { %s2552_s28 = smov %s2554_s20  ;;  %25 = sbr.rel (!%p23_p8) target bundleno = 13 (0xd), region = 121 }
 0x400   :  { %1187 = vsyncpa [#allocation9], 1 }
 0x401   :  { %1189 = vsyncpa [#allocation9 + $0x1], 1 }
 0x402   :  { %1190 = vsyncpa [#allocation12], 1 }
 0x403   :  { %1191 = vsyncpa [#allocation15], 1 }
 0x404   :  { %1192 = vsyncpa [#allocation18], 1 }
 0x405   :  { %1193 = vsyncpa [#allocation10], 1 }
 0x406   :  { %1195 = vsyncpa [#allocation10 + $0x1], 1 }

</bundles_post_ra>
